<compile_context>
chip_gen: v5e
topology: v5e:2x2
jax: 0.10.0
libtpu: 0.0.40
codegen_flags: <defaults>
</compile_context>

<pallas_src>
import functools
import numpy as np
import jax
import jax.numpy as jnp
from jax.experimental import pallas as pl
from jax.experimental.pallas import tpu as pltpu


# -----------------------------------------------------------------------------
# Pallas kernel: the whole FC_net forward, state transposed (features on
# sublanes, batch on lanes).
# -----------------------------------------------------------------------------
def _fc_net_kernel(xT_ref,
                   wlin_ref, blin_ref,                      # (nb+1,C,C), (nb+1,C)
                   wa_ref, ba_ref, wb_ref, bb_ref,          # (nb,H,H), (nb,H)
                   wc_ref, bc_ref, wd_ref, bd_ref,
                   wm_ref, bm_ref, wadd_ref, badd_ref,      # scales pre-folded
                   outT_ref,
                   *, num_blocks, half):
    H = half

    def lin(w, v, b):
        # torch F.linear(x, W) = x @ W.T  ==>  transposed state: W @ x^T + b[:, None]
        return jnp.dot(w, v, preferred_element_type=jnp.float32) + b[:, None]

    x = xT_ref[...].astype(jnp.float32)          # (C, TB), batch on lanes

    # num_blocks is small (3): static unroll.
    # TODO(synk): switch to lax.fori_loop with dynamic weight-ref indexing if
    # num_blocks grows beyond ~8 (vreg pressure / code size).
    for i in range(num_blocks):
        # ---- Lin_bidirectional: one (C,C) matmul, no split ----
        x = lin(wlin_ref[i], x, blin_ref[i])     # (C, TB)

        xa = x[:H, :]                            # (H, TB), sublane-aligned slice
        y = x[H:, :]

        # ---- Affine coupling nets on xa ----
        h = jnp.maximum(xa, 0.0)
        h = lin(wa_ref[i], h, ba_ref[i])
        h = jnp.maximum(h, 0.0)
        h = lin(wb_ref[i], h, bb_ref[i])
        h = h + xa                               # residual 1
        prex = h
        h = jnp.maximum(h, 0.0)
        h = lin(wc_ref[i], h, bc_ref[i])
        h = jnp.maximum(h, 0.0)
        h = lin(wd_ref[i], h, bd_ref[i])
        h = h + prex                             # residual 2
        h = jnp.maximum(h, 0.0)

        m = lin(wm_ref[i], h, bm_ref[i])         # m_scale folded into W/b
        a = lin(wadd_ref[i], h, badd_ref[i])     # add_scale folded into W/b
        y = y * jnp.exp(m) + a
        x = jnp.concatenate([xa, y], axis=0)     # sublane-aligned merge

    # ---- final Lin_bidirectional (index num_blocks) ----
    x = lin(wlin_ref[num_blocks], x, blin_ref[num_blocks])
    outT_ref[...] = x.astype(outT_ref.dtype)


# -----------------------------------------------------------------------------
# One-time parameter preprocessing.  The transposed-state kernel computes
# W @ x^T directly, so the original torch (out, in) layout is used as-is; only
# the m/add scales are folded into their weights/biases.
# -----------------------------------------------------------------------------
def prepare_params(params):
    prepared = dict(
        w_lin=params["w_lin"], b_lin=params["b_lin"],
        w_a=params["w_a"], b_a=params["b_a"],
        w_b=params["w_b"], b_b=params["b_b"],
        w_c=params["w_c"], b_c=params["b_c"],
        w_d=params["w_d"], b_d=params["b_d"],
        # (h @ W.T + b) * s   <=>   (s[:,None]*W) @ h^T + (s*b)[:,None]
        w_m=params["w_m"] * params["m_scale"][:, :, None],
        b_m=params["b_m"] * params["m_scale"],
        w_add=params["w_add"] * params["add_scale"][:, :, None],
        b_add=params["b_add"] * params["add_scale"],
    )
    # TODO(synk): store weights as bf16 (f32 accumulation) for larger H to halve
    # weight VMEM / DMA on v7x's 64 MiB budget.
    return jax.tree_util.tree_map(jnp.asarray, prepared)


# -----------------------------------------------------------------------------
# Wrapper: batch-on-lane layout, grid over batch, weights resident in VMEM.
# -----------------------------------------------------------------------------
def _pick_batch_tile(bp):
    # bp is a multiple of 128.  Prefer 512/256/128-wide tiles with >= 2 grid
    # steps (v7x has 2 TensorCores); otherwise a single full tile.
    for cand in (512, 256, 128):
        if bp % cand == 0 and bp // cand >= 2:
            return cand
    return bp


def fc_net_forward(x, prepared, *, num_blocks, channels):
    B, C = x.shape
    assert C == channels and C % 2 == 0
    H = C // 2
    LANE = 128

    # Batch-on-lane: transpose + pad batch to a lane multiple (wrapper-side
    # layout plumbing; the padded columns are independent and discarded below).
    Bp = ((B + LANE - 1) // LANE) * LANE
    xT = jnp.pad(x.T, ((0, 0), (0, Bp - B)))     # (C, Bp)

    tb = _pick_batch_tile(Bp)
    assert Bp % tb == 0
    grid = (Bp // tb,)

    state_spec = pl.BlockSpec((C, tb), lambda i: (0, i))

    def full_spec(arr):
        nd = arr.ndim
        return pl.BlockSpec(arr.shape, lambda i, _nd=nd: (0,) * _nd)

    weight_args = (prepared["w_lin"], prepared["b_lin"],
                   prepared["w_a"], prepared["b_a"],
                   prepared["w_b"], prepared["b_b"],
                   prepared["w_c"], prepared["b_c"],
                   prepared["w_d"], prepared["b_d"],
                   prepared["w_m"], prepared["b_m"],
                   prepared["w_add"], prepared["b_add"])

    in_specs = [state_spec] + [full_spec(a) for a in weight_args]
    out_specs = pl.BlockSpec((C, tb), lambda i: (0, i))
    out_shape = jax.ShapeDtypeStruct((C, Bp), x.dtype)

    # VMEM budget: double-buffered weight residents + in/out activation tiles
    # plus slack.  Clamped to [32 MiB, 100 MiB] so it never undercuts the
    # default scoped limit and never exceeds physical VMEM.
    weight_bytes = sum(int(np.prod(a.shape)) * a.dtype.itemsize for a in weight_args)
    act_bytes = C * tb * 4
    vmem_bytes = 2 * weight_bytes + 8 * act_bytes + (8 << 20)
    vmem_bytes = int(min(100 << 20, max(vmem_bytes, 32 << 20)))

    kernel = functools.partial(_fc_net_kernel, num_blocks=num_blocks, half=H)
    outT = pl.pallas_call(
        kernel,
        out_shape=out_shape,
        grid=grid,
        in_specs=in_specs,
        out_specs=out_specs,
        compiler_params=pltpu.CompilerParams(
            dimension_semantics=("parallel",),
            vmem_limit_bytes=vmem_bytes),
    )(xT, *weight_args)

    # Un-pad / un-transpose once (XLA side, outside the kernel).
    return outT[:, :B].T


# -----------------------------------------------------------------------------
# Pure-JAX reference (mirrors the PyTorch module exactly) for verification.
# -----------------------------------------------------------------------------
def fc_net_reference(x, params, *, num_blocks, channels):
    H = channels // 2

    def linear(v, w, b):
        return v @ w.T + b[None, :]

    for i in range(num_blocks):
        x = linear(x, params["w_lin"][i], params["b_lin"][i])
        xa, y = x[:, :H], x[:, H:]
        h = jax.nn.relu(xa)
        h = linear(h, params["w_a"][i], params["b_a"][i])
        h = jax.nn.relu(h)
        h = linear(h, params["w_b"][i], params["b_b"][i])
        h = h + xa
        prex = h
        h = jax.nn.relu(h)
        h = linear(h, params["w_c"][i], params["b_c"][i])
        h = jax.nn.relu(h)
        h = linear(h, params["w_d"][i], params["b_d"][i])
        h = h + prex
        h = jax.nn.relu(h)
        m = linear(h, params["w_m"][i], params["b_m"][i]) * params["m_scale"][i]
        a = linear(h, params["w_add"][i], params["b_add"][i]) * params["add_scale"][i]
        x = jnp.concatenate([xa, y * jnp.exp(m) + a], axis=1)
    x = linear(x, params["w_lin"][num_blocks], params["b_lin"][num_blocks])
    return x


# -----------------------------------------------------------------------------
# Deterministic parameter init (shapes follow the PyTorch module __init__).
# -----------------------------------------------------------------------------
def init_params(key, *, num_blocks, channels):
    H = channels // 2
    keys = jax.random.split(key, 20)

    # Lin_bidirectional: orthogonal weight (C, C); bias small random to exercise it.
    w_raw = jax.random.normal(keys[0], (num_blocks + 1, channels, channels), jnp.float32)
    w_lin = jnp.stack([jnp.linalg.qr(w_raw[i])[0] for i in range(num_blocks + 1)])
    b_lin = 0.05 * jax.random.normal(keys[1], (num_blocks + 1, channels), jnp.float32)

    def lin_init(kw, kb):
        w = 0.2 * jax.random.normal(kw, (num_blocks, H, H), jnp.float32)
        b = 0.05 * jax.random.normal(kb, (num_blocks, H), jnp.float32)
        return w, b

    w_a, b_a = lin_init(keys[2], keys[3])
    w_b, b_b = lin_init(keys[4], keys[5])
    w_c, b_c = lin_init(keys[6], keys[7])
    w_d, b_d = lin_init(keys[8], keys[9])
    w_m, b_m = lin_init(keys[10], keys[11])
    w_add, b_add = lin_init(keys[12], keys[13])

    # torch init is zeros; use small deterministic values so exp(m)/a are exercised
    m_scale = 0.1 * jax.random.normal(keys[14], (num_blocks, H), jnp.float32)
    add_scale = 0.1 * jax.random.normal(keys[15], (num_blocks, H), jnp.float32)

    return dict(w_lin=w_lin, b_lin=b_lin,
                w_a=w_a, b_a=b_a, w_b=w_b, b_b=b_b,
                w_c=w_c, b_c=b_c, w_d=w_d, b_d=b_d,
                w_m=w_m, b_m=b_m, w_add=w_add, b_add=b_add,
                m_scale=m_scale, add_scale=add_scale)


if __name__ == "__main__":
    hparams = {"channels": 32, "batch_size": 8, "blocks": 3}
    C = hparams["channels"]
    B = hparams["batch_size"]
    NB = hparams["blocks"]

    key = jax.random.PRNGKey(0)
    k_x, k_p = jax.random.split(key)

    # make_normal_batch: standard multivariate normal samples of shape (B, C)
    x = jax.random.normal(k_x, (B, C), jnp.float32)
    params = init_params(k_p, num_blocks=NB, channels=C)

    # One-time preprocessing: fold m/add scales into weights & biases.
    prepared = prepare_params(params)

    out = fc_net_forward(x, prepared, num_blocks=NB, channels=C)
    out = jax.block_until_ready(out)

    ref = fc_net_reference(x, params, num_blocks=NB, channels=C)
    np.testing.assert_allclose(np.asarray(out), np.asarray(ref), rtol=5e-4, atol=5e-4)

    print("KERNEL_OK")
</pallas_src>

<mosaic_0001>
module attributes {stable_mosaic.version = 11 : i64} {
  func.func @_fc_net_kernel(%arg0: i32, %arg1: memref<32x128xf32, #tpu.memory_space<vmem>>, %arg2: memref<4x32x32xf32, #tpu.memory_space<vmem>>, %arg3: memref<4x32xf32, #tpu.memory_space<vmem>>, %arg4: memref<3x16x16xf32, #tpu.memory_space<vmem>>, %arg5: memref<3x16xf32, #tpu.memory_space<vmem>>, %arg6: memref<3x16x16xf32, #tpu.memory_space<vmem>>, %arg7: memref<3x16xf32, #tpu.memory_space<vmem>>, %arg8: memref<3x16x16xf32, #tpu.memory_space<vmem>>, %arg9: memref<3x16xf32, #tpu.memory_space<vmem>>, %arg10: memref<3x16x16xf32, #tpu.memory_space<vmem>>, %arg11: memref<3x16xf32, #tpu.memory_space<vmem>>, %arg12: memref<3x16x16xf32, #tpu.memory_space<vmem>>, %arg13: memref<3x16xf32, #tpu.memory_space<vmem>>, %arg14: memref<3x16x16xf32, #tpu.memory_space<vmem>>, %arg15: memref<3x16xf32, #tpu.memory_space<vmem>>, %arg16: memref<32x128xf32, #tpu.memory_space<vmem>>) attributes {dimension_semantics = [#tpu.dimension_semantics<parallel>], iteration_bounds = array<i64: 1>, scalar_prefetch = 0 : i64, scratch_operands = 0 : i64, tpu.core_type = #tpu.core_type<tc>, window_params = [{transform_indices = @transform_0, window_bounds = array<i64: 32, 128>}, {pipeline_mode = #tpu.pipeline_mode<synchronous>, transform_indices = @transform_1, window_bounds = array<i64: 4, 32, 32>}, {pipeline_mode = #tpu.pipeline_mode<synchronous>, transform_indices = @transform_2, window_bounds = array<i64: 4, 32>}, {pipeline_mode = #tpu.pipeline_mode<synchronous>, transform_indices = @transform_3, window_bounds = array<i64: 3, 16, 16>}, {pipeline_mode = #tpu.pipeline_mode<synchronous>, transform_indices = @transform_4, window_bounds = array<i64: 3, 16>}, {pipeline_mode = #tpu.pipeline_mode<synchronous>, transform_indices = @transform_5, window_bounds = array<i64: 3, 16, 16>}, {pipeline_mode = #tpu.pipeline_mode<synchronous>, transform_indices = @transform_6, window_bounds = array<i64: 3, 16>}, {pipeline_mode = #tpu.pipeline_mode<synchronous>, transform_indices = @transform_7, window_bounds = array<i64: 3, 16, 16>}, {pipeline_mode = #tpu.pipeline_mode<synchronous>, transform_indices = @transform_8, window_bounds = array<i64: 3, 16>}, {pipeline_mode = #tpu.pipeline_mode<synchronous>, transform_indices = @transform_9, window_bounds = array<i64: 3, 16, 16>}, {pipeline_mode = #tpu.pipeline_mode<synchronous>, transform_indices = @transform_10, window_bounds = array<i64: 3, 16>}, {pipeline_mode = #tpu.pipeline_mode<synchronous>, transform_indices = @transform_11, window_bounds = array<i64: 3, 16, 16>}, {pipeline_mode = #tpu.pipeline_mode<synchronous>, transform_indices = @transform_12, window_bounds = array<i64: 3, 16>}, {pipeline_mode = #tpu.pipeline_mode<synchronous>, transform_indices = @transform_13, window_bounds = array<i64: 3, 16, 16>}, {pipeline_mode = #tpu.pipeline_mode<synchronous>, transform_indices = @transform_14, window_bounds = array<i64: 3, 16>}, {transform_indices = @transform_15, window_bounds = array<i64: 32, 128>}]} {
    %c0 = arith.constant 0 : index
    %c0_0 = arith.constant 0 : index
    %0 = vector.load %arg1[%c0, %c0_0] : memref<32x128xf32, #tpu.memory_space<vmem>>, vector<32x128xf32>
    %c0_1 = arith.constant 0 : index
    %c0_2 = arith.constant 0 : index
    %c0_3 = arith.constant 0 : index
    %1 = vector.load %arg2[%c0_1, %c0_2, %c0_3] : memref<4x32x32xf32, #tpu.memory_space<vmem>>, vector<1x32x32xf32>
    %2 = vector.shape_cast %1 : vector<1x32x32xf32> to vector<32x32xf32>
    %c0_4 = arith.constant 0 : index
    %c0_5 = arith.constant 0 : index
    %3 = vector.load %arg3[%c0_4, %c0_5] : memref<4x32xf32, #tpu.memory_space<vmem>>, vector<1x32xf32>
    %4 = vector.shape_cast %3 : vector<1x32xf32> to vector<32xf32>
    %cst = arith.constant dense<0.000000e+00> : vector<32x128xf32>
    %5 = tpu.matmul %2, %0, %cst {dimension_numbers = #tpu.dot_dimension_numbers<[1], [0], [0], [1], [0, 0, 1, 1], [], []>} : vector<32x32xf32>, vector<32x128xf32>, vector<32x128xf32> -> vector<32x128xf32>
    %6 = vector.shape_cast %4 : vector<32xf32> to vector<32x1xf32>
    %7 = vector.broadcast %6 : vector<32x1xf32> to vector<32x128xf32>
    %8 = arith.addf %5, %7 : vector<32x128xf32>
    %9 = vector.extract_strided_slice %8 {offsets = [0, 0], sizes = [16, 128], strides = [1, 1]} : vector<32x128xf32> to vector<16x128xf32>
    %10 = vector.extract_strided_slice %8 {offsets = [16, 0], sizes = [16, 128], strides = [1, 1]} : vector<32x128xf32> to vector<16x128xf32>
    %cst_6 = arith.constant 0.000000e+00 : f32
    %11 = vector.broadcast %cst_6 : f32 to vector<16x128xf32>
    %12 = arith.maximumf %9, %11 : vector<16x128xf32>
    %c0_7 = arith.constant 0 : index
    %c0_8 = arith.constant 0 : index
    %c0_9 = arith.constant 0 : index
    %13 = vector.load %arg4[%c0_7, %c0_8, %c0_9] : memref<3x16x16xf32, #tpu.memory_space<vmem>>, vector<1x16x16xf32>
    %14 = vector.shape_cast %13 : vector<1x16x16xf32> to vector<16x16xf32>
    %c0_10 = arith.constant 0 : index
    %c0_11 = arith.constant 0 : index
    %15 = vector.load %arg5[%c0_10, %c0_11] : memref<3x16xf32, #tpu.memory_space<vmem>>, vector<1x16xf32>
    %16 = vector.shape_cast %15 : vector<1x16xf32> to vector<16xf32>
    %cst_12 = arith.constant dense<0.000000e+00> : vector<16x128xf32>
    %17 = tpu.matmul %14, %12, %cst_12 {dimension_numbers = #tpu.dot_dimension_numbers<[1], [0], [0], [1], [0, 0, 1, 1], [], []>} : vector<16x16xf32>, vector<16x128xf32>, vector<16x128xf32> -> vector<16x128xf32>
    %18 = vector.shape_cast %16 : vector<16xf32> to vector<16x1xf32>
    %19 = vector.broadcast %18 : vector<16x1xf32> to vector<16x128xf32>
    %20 = arith.addf %17, %19 : vector<16x128xf32>
    %cst_13 = arith.constant 0.000000e+00 : f32
    %21 = vector.broadcast %cst_13 : f32 to vector<16x128xf32>
    %22 = arith.maximumf %20, %21 : vector<16x128xf32>
    %c0_14 = arith.constant 0 : index
    %c0_15 = arith.constant 0 : index
    %c0_16 = arith.constant 0 : index
    %23 = vector.load %arg6[%c0_14, %c0_15, %c0_16] : memref<3x16x16xf32, #tpu.memory_space<vmem>>, vector<1x16x16xf32>
    %24 = vector.shape_cast %23 : vector<1x16x16xf32> to vector<16x16xf32>
    %c0_17 = arith.constant 0 : index
    %c0_18 = arith.constant 0 : index
    %25 = vector.load %arg7[%c0_17, %c0_18] : memref<3x16xf32, #tpu.memory_space<vmem>>, vector<1x16xf32>
    %26 = vector.shape_cast %25 : vector<1x16xf32> to vector<16xf32>
    %cst_19 = arith.constant dense<0.000000e+00> : vector<16x128xf32>
    %27 = tpu.matmul %24, %22, %cst_19 {dimension_numbers = #tpu.dot_dimension_numbers<[1], [0], [0], [1], [0, 0, 1, 1], [], []>} : vector<16x16xf32>, vector<16x128xf32>, vector<16x128xf32> -> vector<16x128xf32>
    %28 = vector.shape_cast %26 : vector<16xf32> to vector<16x1xf32>
    %29 = vector.broadcast %28 : vector<16x1xf32> to vector<16x128xf32>
    %30 = arith.addf %27, %29 : vector<16x128xf32>
    %31 = arith.addf %30, %9 : vector<16x128xf32>
    %cst_20 = arith.constant 0.000000e+00 : f32
    %32 = vector.broadcast %cst_20 : f32 to vector<16x128xf32>
    %33 = arith.maximumf %31, %32 : vector<16x128xf32>
    %c0_21 = arith.constant 0 : index
    %c0_22 = arith.constant 0 : index
    %c0_23 = arith.constant 0 : index
    %34 = vector.load %arg8[%c0_21, %c0_22, %c0_23] : memref<3x16x16xf32, #tpu.memory_space<vmem>>, vector<1x16x16xf32>
    %35 = vector.shape_cast %34 : vector<1x16x16xf32> to vector<16x16xf32>
    %c0_24 = arith.constant 0 : index
    %c0_25 = arith.constant 0 : index
    %36 = vector.load %arg9[%c0_24, %c0_25] : memref<3x16xf32, #tpu.memory_space<vmem>>, vector<1x16xf32>
    %37 = vector.shape_cast %36 : vector<1x16xf32> to vector<16xf32>
    %cst_26 = arith.constant dense<0.000000e+00> : vector<16x128xf32>
    %38 = tpu.matmul %35, %33, %cst_26 {dimension_numbers = #tpu.dot_dimension_numbers<[1], [0], [0], [1], [0, 0, 1, 1], [], []>} : vector<16x16xf32>, vector<16x128xf32>, vector<16x128xf32> -> vector<16x128xf32>
    %39 = vector.shape_cast %37 : vector<16xf32> to vector<16x1xf32>
    %40 = vector.broadcast %39 : vector<16x1xf32> to vector<16x128xf32>
    %41 = arith.addf %38, %40 : vector<16x128xf32>
    %cst_27 = arith.constant 0.000000e+00 : f32
    %42 = vector.broadcast %cst_27 : f32 to vector<16x128xf32>
    %43 = arith.maximumf %41, %42 : vector<16x128xf32>
    %c0_28 = arith.constant 0 : index
    %c0_29 = arith.constant 0 : index
    %c0_30 = arith.constant 0 : index
    %44 = vector.load %arg10[%c0_28, %c0_29, %c0_30] : memref<3x16x16xf32, #tpu.memory_space<vmem>>, vector<1x16x16xf32>
    %45 = vector.shape_cast %44 : vector<1x16x16xf32> to vector<16x16xf32>
    %c0_31 = arith.constant 0 : index
    %c0_32 = arith.constant 0 : index
    %46 = vector.load %arg11[%c0_31, %c0_32] : memref<3x16xf32, #tpu.memory_space<vmem>>, vector<1x16xf32>
    %47 = vector.shape_cast %46 : vector<1x16xf32> to vector<16xf32>
    %cst_33 = arith.constant dense<0.000000e+00> : vector<16x128xf32>
    %48 = tpu.matmul %45, %43, %cst_33 {dimension_numbers = #tpu.dot_dimension_numbers<[1], [0], [0], [1], [0, 0, 1, 1], [], []>} : vector<16x16xf32>, vector<16x128xf32>, vector<16x128xf32> -> vector<16x128xf32>
    %49 = vector.shape_cast %47 : vector<16xf32> to vector<16x1xf32>
    %50 = vector.broadcast %49 : vector<16x1xf32> to vector<16x128xf32>
    %51 = arith.addf %48, %50 : vector<16x128xf32>
    %52 = arith.addf %51, %31 : vector<16x128xf32>
    %cst_34 = arith.constant 0.000000e+00 : f32
    %53 = vector.broadcast %cst_34 : f32 to vector<16x128xf32>
    %54 = arith.maximumf %52, %53 : vector<16x128xf32>
    %c0_35 = arith.constant 0 : index
    %c0_36 = arith.constant 0 : index
    %c0_37 = arith.constant 0 : index
    %55 = vector.load %arg12[%c0_35, %c0_36, %c0_37] : memref<3x16x16xf32, #tpu.memory_space<vmem>>, vector<1x16x16xf32>
    %56 = vector.shape_cast %55 : vector<1x16x16xf32> to vector<16x16xf32>
    %c0_38 = arith.constant 0 : index
    %c0_39 = arith.constant 0 : index
    %57 = vector.load %arg13[%c0_38, %c0_39] : memref<3x16xf32, #tpu.memory_space<vmem>>, vector<1x16xf32>
    %58 = vector.shape_cast %57 : vector<1x16xf32> to vector<16xf32>
    %cst_40 = arith.constant dense<0.000000e+00> : vector<16x128xf32>
    %59 = tpu.matmul %56, %54, %cst_40 {dimension_numbers = #tpu.dot_dimension_numbers<[1], [0], [0], [1], [0, 0, 1, 1], [], []>} : vector<16x16xf32>, vector<16x128xf32>, vector<16x128xf32> -> vector<16x128xf32>
    %60 = vector.shape_cast %58 : vector<16xf32> to vector<16x1xf32>
    %61 = vector.broadcast %60 : vector<16x1xf32> to vector<16x128xf32>
    %62 = arith.addf %59, %61 : vector<16x128xf32>
    %c0_41 = arith.constant 0 : index
    %c0_42 = arith.constant 0 : index
    %c0_43 = arith.constant 0 : index
    %63 = vector.load %arg14[%c0_41, %c0_42, %c0_43] : memref<3x16x16xf32, #tpu.memory_space<vmem>>, vector<1x16x16xf32>
    %64 = vector.shape_cast %63 : vector<1x16x16xf32> to vector<16x16xf32>
    %c0_44 = arith.constant 0 : index
    %c0_45 = arith.constant 0 : index
    %65 = vector.load %arg15[%c0_44, %c0_45] : memref<3x16xf32, #tpu.memory_space<vmem>>, vector<1x16xf32>
    %66 = vector.shape_cast %65 : vector<1x16xf32> to vector<16xf32>
    %cst_46 = arith.constant dense<0.000000e+00> : vector<16x128xf32>
    %67 = tpu.matmul %64, %54, %cst_46 {dimension_numbers = #tpu.dot_dimension_numbers<[1], [0], [0], [1], [0, 0, 1, 1], [], []>} : vector<16x16xf32>, vector<16x128xf32>, vector<16x128xf32> -> vector<16x128xf32>
    %68 = vector.shape_cast %66 : vector<16xf32> to vector<16x1xf32>
    %69 = vector.broadcast %68 : vector<16x1xf32> to vector<16x128xf32>
    %70 = arith.addf %67, %69 : vector<16x128xf32>
    %71 = math.exp %62 : vector<16x128xf32>
    %72 = arith.mulf %10, %71 : vector<16x128xf32>
    %73 = arith.addf %72, %70 : vector<16x128xf32>
    %74 = tpu.concatenate %9, %73 in 0 : vector<16x128xf32>, vector<16x128xf32> -> vector<32x128xf32>
    %c1 = arith.constant 1 : index
    %c0_47 = arith.constant 0 : index
    %c0_48 = arith.constant 0 : index
    %75 = vector.load %arg2[%c1, %c0_47, %c0_48] : memref<4x32x32xf32, #tpu.memory_space<vmem>>, vector<1x32x32xf32>
    %76 = vector.shape_cast %75 : vector<1x32x32xf32> to vector<32x32xf32>
    %c1_49 = arith.constant 1 : index
    %c0_50 = arith.constant 0 : index
    %77 = vector.load %arg3[%c1_49, %c0_50] : memref<4x32xf32, #tpu.memory_space<vmem>>, vector<1x32xf32>
    %78 = vector.shape_cast %77 : vector<1x32xf32> to vector<32xf32>
    %cst_51 = arith.constant dense<0.000000e+00> : vector<32x128xf32>
    %79 = tpu.matmul %76, %74, %cst_51 {dimension_numbers = #tpu.dot_dimension_numbers<[1], [0], [0], [1], [0, 0, 1, 1], [], []>} : vector<32x32xf32>, vector<32x128xf32>, vector<32x128xf32> -> vector<32x128xf32>
    %80 = vector.shape_cast %78 : vector<32xf32> to vector<32x1xf32>
    %81 = vector.broadcast %80 : vector<32x1xf32> to vector<32x128xf32>
    %82 = arith.addf %79, %81 : vector<32x128xf32>
    %83 = vector.extract_strided_slice %82 {offsets = [0, 0], sizes = [16, 128], strides = [1, 1]} : vector<32x128xf32> to vector<16x128xf32>
    %84 = vector.extract_strided_slice %82 {offsets = [16, 0], sizes = [16, 128], strides = [1, 1]} : vector<32x128xf32> to vector<16x128xf32>
    %cst_52 = arith.constant 0.000000e+00 : f32
    %85 = vector.broadcast %cst_52 : f32 to vector<16x128xf32>
    %86 = arith.maximumf %83, %85 : vector<16x128xf32>
    %c1_53 = arith.constant 1 : index
    %c0_54 = arith.constant 0 : index
    %c0_55 = arith.constant 0 : index
    %87 = vector.load %arg4[%c1_53, %c0_54, %c0_55] : memref<3x16x16xf32, #tpu.memory_space<vmem>>, vector<1x16x16xf32>
    %88 = vector.shape_cast %87 : vector<1x16x16xf32> to vector<16x16xf32>
    %c1_56 = arith.constant 1 : index
    %c0_57 = arith.constant 0 : index
    %89 = vector.load %arg5[%c1_56, %c0_57] : memref<3x16xf32, #tpu.memory_space<vmem>>, vector<1x16xf32>
    %90 = vector.shape_cast %89 : vector<1x16xf32> to vector<16xf32>
    %cst_58 = arith.constant dense<0.000000e+00> : vector<16x128xf32>
    %91 = tpu.matmul %88, %86, %cst_58 {dimension_numbers = #tpu.dot_dimension_numbers<[1], [0], [0], [1], [0, 0, 1, 1], [], []>} : vector<16x16xf32>, vector<16x128xf32>, vector<16x128xf32> -> vector<16x128xf32>
    %92 = vector.shape_cast %90 : vector<16xf32> to vector<16x1xf32>
    %93 = vector.broadcast %92 : vector<16x1xf32> to vector<16x128xf32>
    %94 = arith.addf %91, %93 : vector<16x128xf32>
    %cst_59 = arith.constant 0.000000e+00 : f32
    %95 = vector.broadcast %cst_59 : f32 to vector<16x128xf32>
    %96 = arith.maximumf %94, %95 : vector<16x128xf32>
    %c1_60 = arith.constant 1 : index
    %c0_61 = arith.constant 0 : index
    %c0_62 = arith.constant 0 : index
    %97 = vector.load %arg6[%c1_60, %c0_61, %c0_62] : memref<3x16x16xf32, #tpu.memory_space<vmem>>, vector<1x16x16xf32>
    %98 = vector.shape_cast %97 : vector<1x16x16xf32> to vector<16x16xf32>
    %c1_63 = arith.constant 1 : index
    %c0_64 = arith.constant 0 : index
    %99 = vector.load %arg7[%c1_63, %c0_64] : memref<3x16xf32, #tpu.memory_space<vmem>>, vector<1x16xf32>
    %100 = vector.shape_cast %99 : vector<1x16xf32> to vector<16xf32>
    %cst_65 = arith.constant dense<0.000000e+00> : vector<16x128xf32>
    %101 = tpu.matmul %98, %96, %cst_65 {dimension_numbers = #tpu.dot_dimension_numbers<[1], [0], [0], [1], [0, 0, 1, 1], [], []>} : vector<16x16xf32>, vector<16x128xf32>, vector<16x128xf32> -> vector<16x128xf32>
    %102 = vector.shape_cast %100 : vector<16xf32> to vector<16x1xf32>
    %103 = vector.broadcast %102 : vector<16x1xf32> to vector<16x128xf32>
    %104 = arith.addf %101, %103 : vector<16x128xf32>
    %105 = arith.addf %104, %83 : vector<16x128xf32>
    %cst_66 = arith.constant 0.000000e+00 : f32
    %106 = vector.broadcast %cst_66 : f32 to vector<16x128xf32>
    %107 = arith.maximumf %105, %106 : vector<16x128xf32>
    %c1_67 = arith.constant 1 : index
    %c0_68 = arith.constant 0 : index
    %c0_69 = arith.constant 0 : index
    %108 = vector.load %arg8[%c1_67, %c0_68, %c0_69] : memref<3x16x16xf32, #tpu.memory_space<vmem>>, vector<1x16x16xf32>
    %109 = vector.shape_cast %108 : vector<1x16x16xf32> to vector<16x16xf32>
    %c1_70 = arith.constant 1 : index
    %c0_71 = arith.constant 0 : index
    %110 = vector.load %arg9[%c1_70, %c0_71] : memref<3x16xf32, #tpu.memory_space<vmem>>, vector<1x16xf32>
    %111 = vector.shape_cast %110 : vector<1x16xf32> to vector<16xf32>
    %cst_72 = arith.constant dense<0.000000e+00> : vector<16x128xf32>
    %112 = tpu.matmul %109, %107, %cst_72 {dimension_numbers = #tpu.dot_dimension_numbers<[1], [0], [0], [1], [0, 0, 1, 1], [], []>} : vector<16x16xf32>, vector<16x128xf32>, vector<16x128xf32> -> vector<16x128xf32>
    %113 = vector.shape_cast %111 : vector<16xf32> to vector<16x1xf32>
    %114 = vector.broadcast %113 : vector<16x1xf32> to vector<16x128xf32>
    %115 = arith.addf %112, %114 : vector<16x128xf32>
    %cst_73 = arith.constant 0.000000e+00 : f32
    %116 = vector.broadcast %cst_73 : f32 to vector<16x128xf32>
    %117 = arith.maximumf %115, %116 : vector<16x128xf32>
    %c1_74 = arith.constant 1 : index
    %c0_75 = arith.constant 0 : index
    %c0_76 = arith.constant 0 : index
    %118 = vector.load %arg10[%c1_74, %c0_75, %c0_76] : memref<3x16x16xf32, #tpu.memory_space<vmem>>, vector<1x16x16xf32>
    %119 = vector.shape_cast %118 : vector<1x16x16xf32> to vector<16x16xf32>
    %c1_77 = arith.constant 1 : index
    %c0_78 = arith.constant 0 : index
    %120 = vector.load %arg11[%c1_77, %c0_78] : memref<3x16xf32, #tpu.memory_space<vmem>>, vector<1x16xf32>
    %121 = vector.shape_cast %120 : vector<1x16xf32> to vector<16xf32>
    %cst_79 = arith.constant dense<0.000000e+00> : vector<16x128xf32>
    %122 = tpu.matmul %119, %117, %cst_79 {dimension_numbers = #tpu.dot_dimension_numbers<[1], [0], [0], [1], [0, 0, 1, 1], [], []>} : vector<16x16xf32>, vector<16x128xf32>, vector<16x128xf32> -> vector<16x128xf32>
    %123 = vector.shape_cast %121 : vector<16xf32> to vector<16x1xf32>
    %124 = vector.broadcast %123 : vector<16x1xf32> to vector<16x128xf32>
    %125 = arith.addf %122, %124 : vector<16x128xf32>
    %126 = arith.addf %125, %105 : vector<16x128xf32>
    %cst_80 = arith.constant 0.000000e+00 : f32
    %127 = vector.broadcast %cst_80 : f32 to vector<16x128xf32>
    %128 = arith.maximumf %126, %127 : vector<16x128xf32>
    %c1_81 = arith.constant 1 : index
    %c0_82 = arith.constant 0 : index
    %c0_83 = arith.constant 0 : index
    %129 = vector.load %arg12[%c1_81, %c0_82, %c0_83] : memref<3x16x16xf32, #tpu.memory_space<vmem>>, vector<1x16x16xf32>
    %130 = vector.shape_cast %129 : vector<1x16x16xf32> to vector<16x16xf32>
    %c1_84 = arith.constant 1 : index
    %c0_85 = arith.constant 0 : index
    %131 = vector.load %arg13[%c1_84, %c0_85] : memref<3x16xf32, #tpu.memory_space<vmem>>, vector<1x16xf32>
    %132 = vector.shape_cast %131 : vector<1x16xf32> to vector<16xf32>
    %cst_86 = arith.constant dense<0.000000e+00> : vector<16x128xf32>
    %133 = tpu.matmul %130, %128, %cst_86 {dimension_numbers = #tpu.dot_dimension_numbers<[1], [0], [0], [1], [0, 0, 1, 1], [], []>} : vector<16x16xf32>, vector<16x128xf32>, vector<16x128xf32> -> vector<16x128xf32>
    %134 = vector.shape_cast %132 : vector<16xf32> to vector<16x1xf32>
    %135 = vector.broadcast %134 : vector<16x1xf32> to vector<16x128xf32>
    %136 = arith.addf %133, %135 : vector<16x128xf32>
    %c1_87 = arith.constant 1 : index
    %c0_88 = arith.constant 0 : index
    %c0_89 = arith.constant 0 : index
    %137 = vector.load %arg14[%c1_87, %c0_88, %c0_89] : memref<3x16x16xf32, #tpu.memory_space<vmem>>, vector<1x16x16xf32>
    %138 = vector.shape_cast %137 : vector<1x16x16xf32> to vector<16x16xf32>
    %c1_90 = arith.constant 1 : index
    %c0_91 = arith.constant 0 : index
    %139 = vector.load %arg15[%c1_90, %c0_91] : memref<3x16xf32, #tpu.memory_space<vmem>>, vector<1x16xf32>
    %140 = vector.shape_cast %139 : vector<1x16xf32> to vector<16xf32>
    %cst_92 = arith.constant dense<0.000000e+00> : vector<16x128xf32>
    %141 = tpu.matmul %138, %128, %cst_92 {dimension_numbers = #tpu.dot_dimension_numbers<[1], [0], [0], [1], [0, 0, 1, 1], [], []>} : vector<16x16xf32>, vector<16x128xf32>, vector<16x128xf32> -> vector<16x128xf32>
    %142 = vector.shape_cast %140 : vector<16xf32> to vector<16x1xf32>
    %143 = vector.broadcast %142 : vector<16x1xf32> to vector<16x128xf32>
    %144 = arith.addf %141, %143 : vector<16x128xf32>
    %145 = math.exp %136 : vector<16x128xf32>
    %146 = arith.mulf %84, %145 : vector<16x128xf32>
    %147 = arith.addf %146, %144 : vector<16x128xf32>
    %148 = tpu.concatenate %83, %147 in 0 : vector<16x128xf32>, vector<16x128xf32> -> vector<32x128xf32>
    %c2 = arith.constant 2 : index
    %c0_93 = arith.constant 0 : index
    %c0_94 = arith.constant 0 : index
    %149 = vector.load %arg2[%c2, %c0_93, %c0_94] : memref<4x32x32xf32, #tpu.memory_space<vmem>>, vector<1x32x32xf32>
    %150 = vector.shape_cast %149 : vector<1x32x32xf32> to vector<32x32xf32>
    %c2_95 = arith.constant 2 : index
    %c0_96 = arith.constant 0 : index
    %151 = vector.load %arg3[%c2_95, %c0_96] : memref<4x32xf32, #tpu.memory_space<vmem>>, vector<1x32xf32>
    %152 = vector.shape_cast %151 : vector<1x32xf32> to vector<32xf32>
    %cst_97 = arith.constant dense<0.000000e+00> : vector<32x128xf32>
    %153 = tpu.matmul %150, %148, %cst_97 {dimension_numbers = #tpu.dot_dimension_numbers<[1], [0], [0], [1], [0, 0, 1, 1], [], []>} : vector<32x32xf32>, vector<32x128xf32>, vector<32x128xf32> -> vector<32x128xf32>
    %154 = vector.shape_cast %152 : vector<32xf32> to vector<32x1xf32>
    %155 = vector.broadcast %154 : vector<32x1xf32> to vector<32x128xf32>
    %156 = arith.addf %153, %155 : vector<32x128xf32>
    %157 = vector.extract_strided_slice %156 {offsets = [0, 0], sizes = [16, 128], strides = [1, 1]} : vector<32x128xf32> to vector<16x128xf32>
    %158 = vector.extract_strided_slice %156 {offsets = [16, 0], sizes = [16, 128], strides = [1, 1]} : vector<32x128xf32> to vector<16x128xf32>
    %cst_98 = arith.constant 0.000000e+00 : f32
    %159 = vector.broadcast %cst_98 : f32 to vector<16x128xf32>
    %160 = arith.maximumf %157, %159 : vector<16x128xf32>
    %c2_99 = arith.constant 2 : index
    %c0_100 = arith.constant 0 : index
    %c0_101 = arith.constant 0 : index
    %161 = vector.load %arg4[%c2_99, %c0_100, %c0_101] : memref<3x16x16xf32, #tpu.memory_space<vmem>>, vector<1x16x16xf32>
    %162 = vector.shape_cast %161 : vector<1x16x16xf32> to vector<16x16xf32>
    %c2_102 = arith.constant 2 : index
    %c0_103 = arith.constant 0 : index
    %163 = vector.load %arg5[%c2_102, %c0_103] : memref<3x16xf32, #tpu.memory_space<vmem>>, vector<1x16xf32>
    %164 = vector.shape_cast %163 : vector<1x16xf32> to vector<16xf32>
    %cst_104 = arith.constant dense<0.000000e+00> : vector<16x128xf32>
    %165 = tpu.matmul %162, %160, %cst_104 {dimension_numbers = #tpu.dot_dimension_numbers<[1], [0], [0], [1], [0, 0, 1, 1], [], []>} : vector<16x16xf32>, vector<16x128xf32>, vector<16x128xf32> -> vector<16x128xf32>
    %166 = vector.shape_cast %164 : vector<16xf32> to vector<16x1xf32>
    %167 = vector.broadcast %166 : vector<16x1xf32> to vector<16x128xf32>
    %168 = arith.addf %165, %167 : vector<16x128xf32>
    %cst_105 = arith.constant 0.000000e+00 : f32
    %169 = vector.broadcast %cst_105 : f32 to vector<16x128xf32>
    %170 = arith.maximumf %168, %169 : vector<16x128xf32>
    %c2_106 = arith.constant 2 : index
    %c0_107 = arith.constant 0 : index
    %c0_108 = arith.constant 0 : index
    %171 = vector.load %arg6[%c2_106, %c0_107, %c0_108] : memref<3x16x16xf32, #tpu.memory_space<vmem>>, vector<1x16x16xf32>
    %172 = vector.shape_cast %171 : vector<1x16x16xf32> to vector<16x16xf32>
    %c2_109 = arith.constant 2 : index
    %c0_110 = arith.constant 0 : index
    %173 = vector.load %arg7[%c2_109, %c0_110] : memref<3x16xf32, #tpu.memory_space<vmem>>, vector<1x16xf32>
    %174 = vector.shape_cast %173 : vector<1x16xf32> to vector<16xf32>
    %cst_111 = arith.constant dense<0.000000e+00> : vector<16x128xf32>
    %175 = tpu.matmul %172, %170, %cst_111 {dimension_numbers = #tpu.dot_dimension_numbers<[1], [0], [0], [1], [0, 0, 1, 1], [], []>} : vector<16x16xf32>, vector<16x128xf32>, vector<16x128xf32> -> vector<16x128xf32>
    %176 = vector.shape_cast %174 : vector<16xf32> to vector<16x1xf32>
    %177 = vector.broadcast %176 : vector<16x1xf32> to vector<16x128xf32>
    %178 = arith.addf %175, %177 : vector<16x128xf32>
    %179 = arith.addf %178, %157 : vector<16x128xf32>
    %cst_112 = arith.constant 0.000000e+00 : f32
    %180 = vector.broadcast %cst_112 : f32 to vector<16x128xf32>
    %181 = arith.maximumf %179, %180 : vector<16x128xf32>
    %c2_113 = arith.constant 2 : index
    %c0_114 = arith.constant 0 : index
    %c0_115 = arith.constant 0 : index
    %182 = vector.load %arg8[%c2_113, %c0_114, %c0_115] : memref<3x16x16xf32, #tpu.memory_space<vmem>>, vector<1x16x16xf32>
    %183 = vector.shape_cast %182 : vector<1x16x16xf32> to vector<16x16xf32>
    %c2_116 = arith.constant 2 : index
    %c0_117 = arith.constant 0 : index
    %184 = vector.load %arg9[%c2_116, %c0_117] : memref<3x16xf32, #tpu.memory_space<vmem>>, vector<1x16xf32>
    %185 = vector.shape_cast %184 : vector<1x16xf32> to vector<16xf32>
    %cst_118 = arith.constant dense<0.000000e+00> : vector<16x128xf32>
    %186 = tpu.matmul %183, %181, %cst_118 {dimension_numbers = #tpu.dot_dimension_numbers<[1], [0], [0], [1], [0, 0, 1, 1], [], []>} : vector<16x16xf32>, vector<16x128xf32>, vector<16x128xf32> -> vector<16x128xf32>
    %187 = vector.shape_cast %185 : vector<16xf32> to vector<16x1xf32>
    %188 = vector.broadcast %187 : vector<16x1xf32> to vector<16x128xf32>
    %189 = arith.addf %186, %188 : vector<16x128xf32>
    %cst_119 = arith.constant 0.000000e+00 : f32
    %190 = vector.broadcast %cst_119 : f32 to vector<16x128xf32>
    %191 = arith.maximumf %189, %190 : vector<16x128xf32>
    %c2_120 = arith.constant 2 : index
    %c0_121 = arith.constant 0 : index
    %c0_122 = arith.constant 0 : index
    %192 = vector.load %arg10[%c2_120, %c0_121, %c0_122] : memref<3x16x16xf32, #tpu.memory_space<vmem>>, vector<1x16x16xf32>
    %193 = vector.shape_cast %192 : vector<1x16x16xf32> to vector<16x16xf32>
    %c2_123 = arith.constant 2 : index
    %c0_124 = arith.constant 0 : index
    %194 = vector.load %arg11[%c2_123, %c0_124] : memref<3x16xf32, #tpu.memory_space<vmem>>, vector<1x16xf32>
    %195 = vector.shape_cast %194 : vector<1x16xf32> to vector<16xf32>
    %cst_125 = arith.constant dense<0.000000e+00> : vector<16x128xf32>
    %196 = tpu.matmul %193, %191, %cst_125 {dimension_numbers = #tpu.dot_dimension_numbers<[1], [0], [0], [1], [0, 0, 1, 1], [], []>} : vector<16x16xf32>, vector<16x128xf32>, vector<16x128xf32> -> vector<16x128xf32>
    %197 = vector.shape_cast %195 : vector<16xf32> to vector<16x1xf32>
    %198 = vector.broadcast %197 : vector<16x1xf32> to vector<16x128xf32>
    %199 = arith.addf %196, %198 : vector<16x128xf32>
    %200 = arith.addf %199, %179 : vector<16x128xf32>
    %cst_126 = arith.constant 0.000000e+00 : f32
    %201 = vector.broadcast %cst_126 : f32 to vector<16x128xf32>
    %202 = arith.maximumf %200, %201 : vector<16x128xf32>
    %c2_127 = arith.constant 2 : index
    %c0_128 = arith.constant 0 : index
    %c0_129 = arith.constant 0 : index
    %203 = vector.load %arg12[%c2_127, %c0_128, %c0_129] : memref<3x16x16xf32, #tpu.memory_space<vmem>>, vector<1x16x16xf32>
    %204 = vector.shape_cast %203 : vector<1x16x16xf32> to vector<16x16xf32>
    %c2_130 = arith.constant 2 : index
    %c0_131 = arith.constant 0 : index
    %205 = vector.load %arg13[%c2_130, %c0_131] : memref<3x16xf32, #tpu.memory_space<vmem>>, vector<1x16xf32>
    %206 = vector.shape_cast %205 : vector<1x16xf32> to vector<16xf32>
    %cst_132 = arith.constant dense<0.000000e+00> : vector<16x128xf32>
    %207 = tpu.matmul %204, %202, %cst_132 {dimension_numbers = #tpu.dot_dimension_numbers<[1], [0], [0], [1], [0, 0, 1, 1], [], []>} : vector<16x16xf32>, vector<16x128xf32>, vector<16x128xf32> -> vector<16x128xf32>
    %208 = vector.shape_cast %206 : vector<16xf32> to vector<16x1xf32>
    %209 = vector.broadcast %208 : vector<16x1xf32> to vector<16x128xf32>
    %210 = arith.addf %207, %209 : vector<16x128xf32>
    %c2_133 = arith.constant 2 : index
    %c0_134 = arith.constant 0 : index
    %c0_135 = arith.constant 0 : index
    %211 = vector.load %arg14[%c2_133, %c0_134, %c0_135] : memref<3x16x16xf32, #tpu.memory_space<vmem>>, vector<1x16x16xf32>
    %212 = vector.shape_cast %211 : vector<1x16x16xf32> to vector<16x16xf32>
    %c2_136 = arith.constant 2 : index
    %c0_137 = arith.constant 0 : index
    %213 = vector.load %arg15[%c2_136, %c0_137] : memref<3x16xf32, #tpu.memory_space<vmem>>, vector<1x16xf32>
    %214 = vector.shape_cast %213 : vector<1x16xf32> to vector<16xf32>
    %cst_138 = arith.constant dense<0.000000e+00> : vector<16x128xf32>
    %215 = tpu.matmul %212, %202, %cst_138 {dimension_numbers = #tpu.dot_dimension_numbers<[1], [0], [0], [1], [0, 0, 1, 1], [], []>} : vector<16x16xf32>, vector<16x128xf32>, vector<16x128xf32> -> vector<16x128xf32>
    %216 = vector.shape_cast %214 : vector<16xf32> to vector<16x1xf32>
    %217 = vector.broadcast %216 : vector<16x1xf32> to vector<16x128xf32>
    %218 = arith.addf %215, %217 : vector<16x128xf32>
    %219 = math.exp %210 : vector<16x128xf32>
    %220 = arith.mulf %158, %219 : vector<16x128xf32>
    %221 = arith.addf %220, %218 : vector<16x128xf32>
    %222 = tpu.concatenate %157, %221 in 0 : vector<16x128xf32>, vector<16x128xf32> -> vector<32x128xf32>
    %c3 = arith.constant 3 : index
    %c0_139 = arith.constant 0 : index
    %c0_140 = arith.constant 0 : index
    %223 = vector.load %arg2[%c3, %c0_139, %c0_140] : memref<4x32x32xf32, #tpu.memory_space<vmem>>, vector<1x32x32xf32>
    %224 = vector.shape_cast %223 : vector<1x32x32xf32> to vector<32x32xf32>
    %c3_141 = arith.constant 3 : index
    %c0_142 = arith.constant 0 : index
    %225 = vector.load %arg3[%c3_141, %c0_142] : memref<4x32xf32, #tpu.memory_space<vmem>>, vector<1x32xf32>
    %226 = vector.shape_cast %225 : vector<1x32xf32> to vector<32xf32>
    %cst_143 = arith.constant dense<0.000000e+00> : vector<32x128xf32>
    %227 = tpu.matmul %224, %222, %cst_143 {dimension_numbers = #tpu.dot_dimension_numbers<[1], [0], [0], [1], [0, 0, 1, 1], [], []>} : vector<32x32xf32>, vector<32x128xf32>, vector<32x128xf32> -> vector<32x128xf32>
    %228 = vector.shape_cast %226 : vector<32xf32> to vector<32x1xf32>
    %229 = vector.broadcast %228 : vector<32x1xf32> to vector<32x128xf32>
    %230 = arith.addf %227, %229 : vector<32x128xf32>
    %c0_144 = arith.constant 0 : index
    %c0_145 = arith.constant 0 : index
    %231 = vector.load %arg16[%c0_144, %c0_145] : memref<32x128xf32, #tpu.memory_space<vmem>>, vector<32x128xf32>
    tpu.vector_store %arg16[%c0_144, %c0_145], %230 {strides = array<i32>} : memref<32x128xf32, #tpu.memory_space<vmem>>, vector<32x128xf32>,
    return
  }
  func.func @transform_0(%arg0: i32) -> (i32, i32) {
    %c0_i32 = arith.constant 0 : i32
    %c0_i32_0 = arith.constant 0 : i32
    return %c0_i32, %arg0 : i32, i32
  }
  func.func @transform_1(%arg0: i32) -> (i32, i32, i32) {
    %c0_i32 = arith.constant 0 : i32
    %c0_i32_0 = arith.constant 0 : i32
    %c0_i32_1 = arith.constant 0 : i32
    %c0_i32_2 = arith.constant 0 : i32
    return %c0_i32, %c0_i32_0, %c0_i32_1 : i32, i32, i32
  }
  func.func @transform_2(%arg0: i32) -> (i32, i32) {
    %c0_i32 = arith.constant 0 : i32
    %c0_i32_0 = arith.constant 0 : i32
    %c0_i32_1 = arith.constant 0 : i32
    return %c0_i32, %c0_i32_0 : i32, i32
  }
  func.func @transform_3(%arg0: i32) -> (i32, i32, i32) {
    %c0_i32 = arith.constant 0 : i32
    %c0_i32_0 = arith.constant 0 : i32
    %c0_i32_1 = arith.constant 0 : i32
    %c0_i32_2 = arith.constant 0 : i32
    return %c0_i32, %c0_i32_0, %c0_i32_1 : i32, i32, i32
  }
  func.func @transform_4(%arg0: i32) -> (i32, i32) {
    %c0_i32 = arith.constant 0 : i32
    %c0_i32_0 = arith.constant 0 : i32
    %c0_i32_1 = arith.constant 0 : i32
    return %c0_i32, %c0_i32_0 : i32, i32
  }
  func.func @transform_5(%arg0: i32) -> (i32, i32, i32) {
    %c0_i32 = arith.constant 0 : i32
    %c0_i32_0 = arith.constant 0 : i32
    %c0_i32_1 = arith.constant 0 : i32
    %c0_i32_2 = arith.constant 0 : i32
    return %c0_i32, %c0_i32_0, %c0_i32_1 : i32, i32, i32
  }
  func.func @transform_6(%arg0: i32) -> (i32, i32) {
    %c0_i32 = arith.constant 0 : i32
    %c0_i32_0 = arith.constant 0 : i32
    %c0_i32_1 = arith.constant 0 : i32
    return %c0_i32, %c0_i32_0 : i32, i32
  }
  func.func @transform_7(%arg0: i32) -> (i32, i32, i32) {
    %c0_i32 = arith.constant 0 : i32
    %c0_i32_0 = arith.constant 0 : i32
    %c0_i32_1 = arith.constant 0 : i32
    %c0_i32_2 = arith.constant 0 : i32
    return %c0_i32, %c0_i32_0, %c0_i32_1 : i32, i32, i32
  }
  func.func @transform_8(%arg0: i32) -> (i32, i32) {
    %c0_i32 = arith.constant 0 : i32
    %c0_i32_0 = arith.constant 0 : i32
    %c0_i32_1 = arith.constant 0 : i32
    return %c0_i32, %c0_i32_0 : i32, i32
  }
  func.func @transform_9(%arg0: i32) -> (i32, i32, i32) {
    %c0_i32 = arith.constant 0 : i32
    %c0_i32_0 = arith.constant 0 : i32
    %c0_i32_1 = arith.constant 0 : i32
    %c0_i32_2 = arith.constant 0 : i32
    return %c0_i32, %c0_i32_0, %c0_i32_1 : i32, i32, i32
  }
  func.func @transform_10(%arg0: i32) -> (i32, i32) {
    %c0_i32 = arith.constant 0 : i32
    %c0_i32_0 = arith.constant 0 : i32
    %c0_i32_1 = arith.constant 0 : i32
    return %c0_i32, %c0_i32_0 : i32, i32
  }
  func.func @transform_11(%arg0: i32) -> (i32, i32, i32) {
    %c0_i32 = arith.constant 0 : i32
    %c0_i32_0 = arith.constant 0 : i32
    %c0_i32_1 = arith.constant 0 : i32
    %c0_i32_2 = arith.constant 0 : i32
    return %c0_i32, %c0_i32_0, %c0_i32_1 : i32, i32, i32
  }
  func.func @transform_12(%arg0: i32) -> (i32, i32) {
    %c0_i32 = arith.constant 0 : i32
    %c0_i32_0 = arith.constant 0 : i32
    %c0_i32_1 = arith.constant 0 : i32
    return %c0_i32, %c0_i32_0 : i32, i32
  }
  func.func @transform_13(%arg0: i32) -> (i32, i32, i32) {
    %c0_i32 = arith.constant 0 : i32
    %c0_i32_0 = arith.constant 0 : i32
    %c0_i32_1 = arith.constant 0 : i32
    %c0_i32_2 = arith.constant 0 : i32
    return %c0_i32, %c0_i32_0, %c0_i32_1 : i32, i32, i32
  }
  func.func @transform_14(%arg0: i32) -> (i32, i32) {
    %c0_i32 = arith.constant 0 : i32
    %c0_i32_0 = arith.constant 0 : i32
    %c0_i32_1 = arith.constant 0 : i32
    return %c0_i32, %c0_i32_0 : i32, i32
  }
  func.func @transform_15(%arg0: i32) -> (i32, i32) {
    %c0_i32 = arith.constant 0 : i32
    %c0_i32_0 = arith.constant 0 : i32
    return %c0_i32, %arg0 : i32, i32
  }
}

</mosaic_0001>

<bundles_post_ra>
// kernel: tpu_custom_call.1
= control target key start
LH: loop header
LB: loop body
LE: loop exit
PB: predicated region body
PF: predicated region fallthrough
CT: control target
= control target key end

     0   :  { %20 = vsyncpa [#allocation3], 0  ;;  %s2246_s0 = inlined_call_operand.hbm [shape: f32[32,128], index: 0, kind: input, shape index: {}]   ;;  %s2247_s1 = inlined_call_operand.hbm [shape: f32[4,32,32], index: 1, kind: input, shape index: {}]   ;;  %s2248_s2 = inlined_call_operand.hbm [shape: f32[4,32], index: 2, kind: input, shape index: {}]   ;;  %s2249_s3 = inlined_call_operand.hbm [shape: f32[3,16,16], index: 3, kind: input, shape index: {}]   ;;  %s2250_s4 = inlined_call_operand.hbm [shape: f32[3,16], index: 4, kind: input, shape index: {}]   ;;  %s2251_s5 = inlined_call_operand.hbm [shape: f32[3,16,16], index: 5, kind: input, shape index: {}]   ;;  %s2252_s6 = inlined_call_operand.vmem [shape: f32[3,16], index: 6, kind: input, shape index: {}]   ;;  %s2253_s7 = inlined_call_operand.hbm [shape: f32[3,16,16], index: 7, kind: input, shape index: {}]   ;;  %s2254_s8 = inlined_call_operand.hbm [shape: f32[3,16], index: 8, kind: input, shape index: {}]   ;;  %s2255_s9 = inlined_call_operand.hbm [shape: f32[3,16,16], index: 9, kind: input, shape index: {}]   ;;  %s2256_s10 = inlined_call_operand.vmem [shape: f32[3,16], index: 10, kind: input, shape index: {}]   ;;  %s2257_s11 = inlined_call_operand.hbm [shape: f32[3,16,16], index: 11, kind: input, shape index: {}]   ;;  %s2258_s12 = inlined_call_operand.hbm [shape: f32[3,16], index: 12, kind: input, shape index: {}]   ;;  %s2259_s13 = inlined_call_operand.hbm [shape: f32[3,16,16], index: 13, kind: input, shape index: {}]   ;;  %s2260_s14 = inlined_call_operand.vmem [shape: f32[3,16], index: 14, kind: input, shape index: {}]   ;;  %s2261_s15 = inlined_call_operand.hbm [shape: f32[32,128], index: 15, kind: output, shape index: {}]  }
   0x1   :  { %21 = vsyncpa [#allocation6], 0 }
   0x2   :  { %22 = vsyncpa [#allocation9], 0 }
   0x3   :  { %23 = vsyncpa [#allocation12], 0 }
   0x4   :  { %24 = vsyncpa [#allocation15], 0 }
   0x5   :  { %25 = vsyncpa [#allocation18], 0 }
   0x6   :  { %26 = vsyncpa [#allocation21], 0 }
   0x7   :  { %27 = vsyncpa [#allocation4], 0  ;;  %s45_s20 = sshll.u32 %s2247_s1, 4  ;;  %s1910_s21 = smov [#allocation5]   ;;  %s46_s20 = int_to_ptr.hbm [resolvable:$true] %s45_s20 }
   0x8   :  { %s47_s22 = sshll.u32 %s1910_s21, 4  ;;  %s69_s25 = sshll.u32 %s2249_s3, 4  ;;  %s48_s22 = int_to_ptr.vmem [resolvable:$true] %s47_s22  ;;  %s70_s25 = int_to_ptr.hbm [resolvable:$true] %s69_s25 }
   0x9   :  { %s1911_s26 = smov 128   ;;  %s1912_s27 = smov 8  }
   0xa   :  { %53 = dma.hbm_to_vmem [thread:$0]  %s46_s20, 2048, %s48_s22, [#allocation6], %s1911_s26, %s1911_s26, %s1912_s27  }
   0xb   :  { %s1913_s28 = smov [#allocation8]   ;;  %s93_s1 = sshll.u32 %s2251_s5, 4  ;;  %s94_s1 = int_to_ptr.hbm [resolvable:$true] %s93_s1 }
   0xc   :  { %s71_s29 = sshll.u32 %s1913_s28, 4  ;;  %s122_s18 = sshll.u32 %s2254_s8, 4  ;;  %s72_s29 = int_to_ptr.vmem [resolvable:$true] %s71_s29  ;;  %s123_s18 = int_to_ptr.hbm [resolvable:$true] %s122_s18 }
   0xd   :  { %77 = dma.hbm_to_vmem [thread:$0]  %s70_s25, 768, %s72_s29, [#allocation9], %s1911_s26, %s1911_s26, %s1912_s27  }
   0xe   :  { %s1914_s19 = smov [#allocation11]   ;;  %s1915_s20 = smov [#allocation14]  }
   0xf   :  { %s95_s21 = sshll.u32 %s1914_s19, 4  ;;  %s124_s5 = sshll.u32 %s1915_s20, 4  ;;  %s96_s21 = int_to_ptr.vmem [resolvable:$true] %s95_s21  ;;  %s125_s5 = int_to_ptr.vmem [resolvable:$true] %s124_s5 }
  0x10   :  { %101 = dma.hbm_to_vmem [thread:$0]  %s94_s1, 768, %s96_s21, [#allocation12], %s1911_s26, %s1911_s26, %s1912_s27  }
  0x11   :  { %s147_s24 = sshll.u32 %s2257_s11, 4  ;;  %s32_s8 = sshll.u32 %s2246_s0, 4  ;;  %s148_s24 = int_to_ptr.hbm [resolvable:$true] %s147_s24  ;;  %s33_s8 = int_to_ptr.hbm [resolvable:$true] %s32_s8 }
  0x12   :  { %127 = dma.hbm_to_vmem [thread:$0]  %s123_s18, 64, %s125_s5, [#allocation15]  }
  0x13   :  { %s1916_s29 = smov [#allocation17]   ;;  %s1917_s16 = smov [#allocation2]  }
  0x14   :  { %s149_s30 = sshll.u32 %s1916_s29, 4  ;;  %s34_s1 = sshll.u32 %s1917_s16, 4  ;;  %s150_s30 = int_to_ptr.vmem [resolvable:$true] %s149_s30  ;;  %s35_s1 = int_to_ptr.vmem [resolvable:$true] %s34_s1 }
  0x15   :  { %155 = dma.hbm_to_vmem [thread:$0]  %s148_s24, 768, %s150_s30, [#allocation18], %s1911_s26, %s1911_s26, %s1912_s27  }
  0x16   :  { %s59_s11 = sshll.u32 %s2248_s2, 4  ;;  %s83_s19 = sshll.u32 %s2250_s4, 4  ;;  %s60_s11 = int_to_ptr.hbm [resolvable:$true] %s59_s11  ;;  %s84_s19 = int_to_ptr.hbm [resolvable:$true] %s83_s19 }
  0x17   :  { %40 = dma.hbm_to_vmem [thread:$0]  %s33_s8, 512, %s35_s1, [#allocation3], %s1911_s26, %s1911_s26, %s1912_s27  }
  0x18   :  { %s1918_s21 = smov [#allocation7]   ;;  %s1919_s5 = smov [#allocation10]  }
  0x19   :  { %s61_s20 = sshll.u32 %s1918_s21, 4  ;;  %s85_s22 = sshll.u32 %s1919_s5, 4  ;;  %s62_s20 = int_to_ptr.vmem [resolvable:$true] %s61_s20  ;;  %s86_s22 = int_to_ptr.vmem [resolvable:$true] %s85_s22 }
  0x1a   :  { %64 = dma.hbm_to_vmem [thread:$0]  %s60_s11, 64, %s62_s20, [#allocation6]  }
  0x1b   :  { %s108_s2 = sshll.u32 %s2253_s7, 4  ;;  %s132_s8 = sshll.u32 %s2255_s9, 4  ;;  %s109_s2 = int_to_ptr.hbm [resolvable:$true] %s108_s2  ;;  %s133_s8 = int_to_ptr.hbm [resolvable:$true] %s132_s8 }
  0x1c   :  { %88 = dma.hbm_to_vmem [thread:$0]  %s84_s19, 64, %s86_s22, [#allocation9]  }
  0x1d   :  { %s1920_s29 = smov [#allocation13]   ;;  %s1921_s30 = smov [#allocation16]  }
  0x1e   :  { %s110_s4 = sshll.u32 %s1920_s29, 4  ;;  %s134_s16 = sshll.u32 %s1921_s30, 4  ;;  %s111_s4 = int_to_ptr.vmem [resolvable:$true] %s110_s4  ;;  %s135_s16 = int_to_ptr.vmem [resolvable:$true] %s134_s16 }
  0x1f   :  { %116 = dma.hbm_to_vmem [thread:$0]  %s109_s2, 768, %s111_s4, [#allocation12], %s1911_s26, %s1911_s26, %s1912_s27  }
  0x20   :  { %s161_s7 = sshll.u32 %s2258_s12, 4  ;;  %s171_s11 = sshll.u32 %s2259_s13, 4  ;;  %s162_s7 = int_to_ptr.hbm [resolvable:$true] %s161_s7  ;;  %s172_s11 = int_to_ptr.hbm [resolvable:$true] %s171_s11 }
  0x21   :  { %140 = dma.hbm_to_vmem [thread:$0]  %s133_s8, 768, %s135_s16, [#allocation15], %s1911_s26, %s1911_s26, %s1912_s27  }
  0x22   :  { %s1922_s0 = smov [#allocation19]   ;;  %s1923_s19 = smov [#allocation20]  }
  0x23   :  { %s163_s18 = sshll.u32 %s1922_s0, 4  ;;  %s173_s21 = sshll.u32 %s1923_s19, 4  ;;  %s164_s18 = int_to_ptr.vmem [resolvable:$true] %s163_s18  ;;  %s174_s21 = int_to_ptr.vmem [resolvable:$true] %s173_s21 }
  0x24   :  { %166 = dma.hbm_to_vmem [thread:$0]  %s162_s7, 64, %s164_s18, [#allocation18]  }
  0x25   :  { %179 = dma.hbm_to_vmem [thread:$0]  %s172_s11, 768, %s174_s21, [#allocation21], %s1911_s26, %s1911_s26, %s1912_s27  }
  0x26   :  { %1894 = dma.done.wait [#allocation3], 512  }
  0x27   :  { %1895 = vsyncadd [#allocation3], 4294966784 }
  0x28   :  { %1896 = dma.done.wait [#allocation6], 2112  }
  0x29   :  { %1897 = vsyncadd [#allocation6], 4294965184 }
  0x2a   :  { %1898 = dma.done.wait [#allocation9], 832  }
  0x2b   :  { %1899 = vsyncadd [#allocation9], 4294966464 }
  0x2c   :  { %1900 = dma.done.wait [#allocation12], 1536  }
  0x2d   :  { %1901 = vsyncadd [#allocation12], 4294965760 }
  0x2e   :  { %1902 = dma.done.wait [#allocation15], 832  }
  0x2f   :  { %1903 = vsyncadd [#allocation15], 4294966464 }
  0x30   :  { %1904 = dma.done.wait [#allocation18], 832  }
  0x31   :  { %1905 = vsyncadd [#allocation18], 4294966464 }
  0x32   :  { %1906 = dma.done.wait [#allocation21], 768  }
  0x33   :  { %1907 = vsyncadd [#allocation21], 4294966528  ;;  %v240_v0 = vlaneseq  ;;  %v233_v3 = vld [vmem:[#allocation2 + $0x18] sm:$0xff]  ;;  %v232_v4 = vld [vmem:[#allocation2 + $0x10] sm:$0xff]  ;;  %vm264_vm0 = vcmask 261120   ;;  %vm324_vm1 = vcmask 130048  }
  0x34   :  { %289 = vmatpush.msra.mxu0 %v233_v3  ;;  %v231_v5 = vld [vmem:[#allocation2 + $0x8] sm:$0xff]  ;;  %v1548_v6 = vld [vmem:[#allocation7] ss:$0 sm:$0xff]  ;;  %v236_v12 = vld [vmem:[#allocation5 + $0x10] sm:$0xff]  ;;  %s1421_s17 = sshll.u32 %s2261_s15, 4  ;;  %s1422_s17 = int_to_ptr.hbm [resolvable:$true] %s1421_s17 }
  0x35   :  { %v2065_v1 = vshrl.u32 %v240_v0, 7  ;;  %v230_v7 = vld [vmem:[#allocation2] sm:$0xff]  ;;  %v235_v9 = vld [vmem:[#allocation5 + $0x8] sm:$0xff]  ;;  %v237_v14 = vld [vmem:[#allocation5 + $0x18] sm:$0xff] }
  0x36   :  { %290 = vmatpush.msra.mxu0 %v232_v4  ;;  %v234_v8 = vld [vmem:[#allocation5] sm:$0xff]  ;;  %v1551_v15 = vld [vmem:[#allocation14] ss:$0 sm:$0xff]  ;;  %v1552_v16 = vld [vmem:[#allocation10] ss:$0 sm:$0xff] }
  0x37   :  { %v2068_v2 = vadd.s32 8, %v2065_v1  ;;  %v1549_v10 = vld [vmem:[%s2252_s6] ss:$0 sm:$0xff]  ;;  %v2086_v13 = vadd.s32 16, %v2065_v1  ;;  %v1553_v18 = vld [vmem:[#allocation19] ss:$0 sm:$0xff] }
  0x38   :  { %291 = vmatpush.msra.mxu0 %v231_v5  ;;  %v1550_v11 = vld [vmem:[%s2256_s10] ss:$0 sm:$0xff]  ;;  %v2094_v21 = vadd.s32 24, %v2065_v1  ;;  %v309_v27 = vld [vmem:[#allocation8 + $0x8] sm:$0xff]  ;;  %v308_v28 = vld [vmem:[#allocation8] sm:$0xff] }
  0x39   :  { %1511 = vset.pattern.permute.xlu0 %v2068_v2  ;;  %1515 = vset.pattern.permute.xlu2 %v2068_v2  ;;  %v356_v39 = vld [vmem:[#allocation11] sm:$0xff]  ;;  %v357_v40 = vld [vmem:[#allocation11 + $0x8] sm:$0xff]  ;;  %v405_v51 = vld [vmem:[#allocation13] sm:$0xff] }
  0x3a   :  { %1513 = vset.pattern.permute.xlu1 %v2068_v2  ;;  %292 = vmatpush.msra.mxu0 %v230_v7  ;;  %v406_v52 = vld [vmem:[#allocation13 + $0x8] sm:$0xff]  ;;  %v452_v61 = vld [vmem:[#allocation16] sm:$0xff]  ;;  %v453_v62 = vld [vmem:[#allocation16 + $0x8] sm:$0xff] }
  0x3b   :  { %1440 = vmatmul.msk.f32.vlgmr.msra.gmra.mxu0 %vm264_vm0, %v234_v8  ;;  %v1554_v63 = vld [vmem:[%s2260_s14] ss:$0 sm:$0xff]  ;;  %v2124_v0 = vld [vmem:[#allocation7 + $0x1] ss:$0 sm:$0xff] }
  0x41   :  { %250 = vperm.xlu0 %1511, %v1548_v6   ;;  %370 = vperm.xlu2 %1515, %v1549_v10  }
  0x42   :  { %322 = vperm.xlu1 %1513, %v1552_v16  }
  0x43   :  { %1441 = vmatmul.msk.f32.gmra.mxu0 %vm264_vm0, %v235_v9 }
  0x49   :  { %1512 = vset.pattern.permute.xlu0 %v2065_v1  ;;  %1516 = vset.pattern.permute.xlu2 %v2065_v1 }
  0x4a   :  { %1514 = vset.pattern.permute.xlu1 %v2065_v1 }
  0x4b   :  { %1442 = vmatmul.msk.f32.gmra.mxu0 %vm264_vm0, %v236_v12 }
  0x51   :  { %244 = vperm.xlu0 %1512, %v1548_v6   ;;  %364 = vperm.xlu2 %1516, %v1549_v10  }
  0x52   :  { %316 = vperm.xlu1 %1514, %v1552_v16   ;;  %v502_v16 = vld [vmem:[#allocation17 + $0x8] sm:$0xff] }
  0x53   :  { %1443 = vmatmul.msk.f32.gmra.mxu0 %vm264_vm0, %v237_v14  ;;  %v501_v14 = vld [vmem:[#allocation17] sm:$0xff] }
  0x59   :  { %1518 = vset.pattern.permute.xlu0 %v2068_v2  ;;  %413 = vperm.xlu2 %1516, %v1551_v15  }
  0x5a   :  { %1517 = vset.pattern.permute.xlu1 %v2068_v2 }
  0x61   :  { %466 = vperm.xlu0 %1518, %v1550_v11   ;;  %1520 = vset.pattern.permute.xlu2 %v2068_v2 }
  0x62   :  { %419 = vperm.xlu1 %1517, %v1551_v15   ;;  %v546_v15 = vld [vmem:[#allocation20] sm:$0xff] }
  0x69   :  { %1522 = vset.pattern.permute.xlu0 %v2086_v13  ;;  %515 = vperm.xlu2 %1520, %v1553_v18  }
  0x6a   :  { %1519 = vset.pattern.permute.xlu1 %v2065_v1 }
  0x71   :  { %256 = vperm.xlu0 %1522, %v1548_v6   ;;  %1521 = vset.pattern.permute.xlu2 %v2094_v21 }
  0x72   :  { %460 = vperm.xlu1 %1519, %v1550_v11  }
  0x79   :  { %1525 = vset.pattern.permute.xlu0 %v2068_v2  ;;  %262 = vperm.xlu2 %1521, %v1548_v6  }
  0x7a   :  { %509 = vperm.xlu1 %1519, %v1553_v18  }
  0x81   :  { %1524 = vset.pattern.permute.xlu2 %v2065_v1 }
  0x82   :  { %1523 = vset.pattern.permute.xlu1 %v2068_v2 }
  0x89   :  { %554 = vperm.xlu2 %1524, %v1554_v63  }
  0x8a   :  { %560 = vperm.xlu1 %1523, %v1554_v63  }
  0x91   :  { %610 = vperm.xlu2 %1524, %v2124_v0  }
  0x92   :  { %616 = vperm.xlu1 %1523, %v2124_v0  }
  0x99   :  { %1527 = vset.pattern.permute.xlu2 %v2068_v2 }
  0x9a   :  { %1526 = vset.pattern.permute.xlu1 %v2065_v1 }
  0x9b   :  { %v371_v41 = vpop.permute.xlu2 %370 }
  0xab   :  { %v365_v43 = vpop.permute.xlu2 %364 }
  0xb3   :  { %v251_v17 = vpop.permute.xlu0 %250  ;;  %v414_v55 = vpop.permute.xlu2 %413 }
  0xb4   :  { %v323_v31 = vpop.permute.xlu1 %322 }
  0xb8   :  { %v294_v19 = vpop.f32.mrf.mxu0 }
  0xc0   :  { %v297_v22 = vpop.f32.mrf.mxu0 }
  0xc1   :  { %v2098_v24 = vadd.f32 %v297_v22, %v251_v17  ;;  %v547_v17 = vld [vmem:[#allocation20 + $0x8] sm:$0xff] }
  0xc3   :  { %v245_v20 = vpop.permute.xlu0 %244  ;;  %v307_v25 = vmax.f32 %v2098_v24, 0.0  ;;  %v516_v18 = vpop.permute.xlu2 %515 }
  0xc4   :  { %v2096_v23 = vadd.f32 %v294_v19, %v245_v20  ;;  %v317_v32 = vpop.permute.xlu1 %316 }
  0xc5   :  { %345 = vmatpush.msrb.mxu0 %v307_v25  ;;  %1492 = vmatpush.msra.mxu2 %v307_v25 }
  0xc6   :  { %v306_v26 = vmax.f32 %v2096_v23, 0.0 }
  0xc8   :  { %346 = vmatpush.msrb.mxu0 %v306_v26  ;;  %1493 = vmatpush.msra.mxu2 %v306_v26  ;;  %v2109_v29 = vpop.f32.mrf.mxu0 }
  0xc9   :  { %1445 = vmatmul.msk.f32.vlgmr.msra.gmra.mxu2 %vm324_vm1, %v309_v27  ;;  %1444 = vmatmul.msk.f32.vlgmr.msrb.gmra.mxu0 %vm324_vm1, %v308_v28 }
  0xd0   :  { %v2111_v30 = vpop.f32.mrf.mxu0 }
  0xd3   :  { %v467_v6 = vpop.permute.xlu0 %466  ;;  %v263_v28 = vpop.permute.xlu2 %262 }
  0xd4   :  { %v420_v54 = vpop.permute.xlu1 %419 }
  0xe4   :  { %v461_v3 = vpop.permute.xlu1 %460 }
  0xec   :  { %v510_v20 = vpop.permute.xlu1 %509 }
 0x146   :  { %v348_v33 = vpop.f32.mrf.mxu0 }
 0x147   :  { %v349_v34 = vadd.f32 %v348_v33, %v317_v32  ;;  %v257_v33 = vpop.permute.xlu0 %256 }
 0x149   :  { %v354_v38 = vmax.f32 %v349_v34, 0.0 }
 0x14c   :  { %v351_v35 = vpop.f32.mrf.mxu2 }
 0x14d   :  { %v352_v36 = vadd.f32 %v351_v35, %v323_v31 }
 0x14f   :  { %v355_v37 = vmax.f32 %v352_v36, 0.0  ;;  %v561_v36 = vpop.permute.xlu1 %560 }
 0x151   :  { %392 = vmatpush.msrb.mxu2 %v355_v37  ;;  %v555_v37 = vpop.permute.xlu2 %554 }
 0x153   :  { %393 = vmatpush.msrb.mxu2 %v354_v38  ;;  %v301_v38 = vadd.f32 %v2109_v29, %v257_v33  ;;  %v1556_v29 = vld [vmem:[#allocation10 + $0x1] ss:$0 sm:$0xff] }
 0x154   :  { %1446 = vmatmul.msk.f32.vlgmr.msrb.gmra.mxu2 %vm324_vm1, %v356_v39  ;;  %v304_v39 = vadd.f32 %v2111_v30, %v263_v28  ;;  %v1557_v30 = vld [vmem:[%s2252_s6 + $0x1] ss:$0 sm:$0xff]  ;;  %682 = vperm.xlu1 %1526, %v1556_v29  }
 0x155   :  { %688 = vperm.xlu0 %1525, %v1556_v29   ;;  %736 = vperm.xlu2 %1527, %v1557_v30  }
 0x15c   :  { %1447 = vmatmul.msk.f32.gmra.mxu2 %vm324_vm1, %v357_v40  ;;  %730 = vperm.xlu1 %1526, %v1557_v30   ;;  %v870_v30 = vld [vmem:[#allocation17 + $0x10] sm:$0xff] }
 0x15d   :  { %1528 = vset.pattern.permute.xlu0 %v2065_v1 }
 0x164   :  { %1529 = vset.pattern.permute.xlu1 %v2068_v2 }
 0x1d7   :  { %v395_v42 = vpop.f32.mrf.mxu2 }
 0x1d8   :  { %v396_v44 = vadd.f32 %v395_v42, %v365_v43 }
 0x1da   :  { %v401_v47 = vadd.f32 %v396_v44, %v2096_v23 }
 0x1dc   :  { %v403_v50 = vmax.f32 %v401_v47, 0.0 }
 0x1df   :  { %v398_v45 = vpop.f32.mrf.mxu2 }
 0x1e0   :  { %v399_v46 = vadd.f32 %v398_v45, %v371_v41 }
 0x1e2   :  { %v402_v48 = vadd.f32 %v399_v46, %v2098_v24 }
 0x1e4   :  { %v404_v49 = vmax.f32 %v402_v48, 0.0 }
 0x1e6   :  { %441 = vmatpush.msra.mxu3 %v404_v49 }
 0x1e8   :  { %442 = vmatpush.msra.mxu3 %v403_v50  ;;  %v611_v50 = vpop.permute.xlu2 %610 }
 0x1e9   :  { %1448 = vmatmul.msk.f32.vlgmr.msra.gmra.mxu3 %vm324_vm1, %v405_v51 }
 0x1f1   :  { %1449 = vmatmul.msk.f32.gmra.mxu3 %vm324_vm1, %v406_v52 }
 0x26c   :  { %v444_v53 = vpop.f32.mrf.mxu3 }
 0x26d   :  { %v445_v57 = vadd.f32 %v444_v53, %v414_v55  ;;  %v674_v55 = vld [vmem:[#allocation8 + $0x10] sm:$0xff] }
 0x26f   :  { %v450_v60 = vmax.f32 %v445_v57, 0.0  ;;  %v1558_v57 = vld [vmem:[#allocation14 + $0x1] ss:$0 sm:$0xff] }
 0x270   :  { %786 = vperm.xlu2 %1527, %v1558_v57   ;;  %780 = vperm.xlu0 %1528, %v1558_v57  }
 0x274   :  { %v447_v56 = vpop.f32.mrf.mxu3 }
 0x275   :  { %v448_v58 = vadd.f32 %v447_v56, %v420_v54  ;;  %v675_v56 = vld [vmem:[#allocation8 + $0x18] sm:$0xff] }
 0x277   :  { %v451_v59 = vmax.f32 %v448_v58, 0.0 }
 0x278   :  { %1530 = vset.pattern.permute.xlu2 %v2065_v1  ;;  %1531 = vset.pattern.permute.xlu0 %v2094_v21 }
 0x279   :  { %488 = vmatpush.msra.mxu1 %v451_v59  ;;  %1494 = vmatpush.msrb.mxu3 %v451_v59 }
 0x27b   :  { %489 = vmatpush.msra.mxu1 %v450_v60  ;;  %1495 = vmatpush.msrb.mxu3 %v450_v60  ;;  %v689_v60 = vpop.permute.xlu0 %688 }
 0x27c   :  { %1450 = vmatmul.msk.f32.vlgmr.msra.gmra.mxu1 %vm324_vm1, %v452_v61  ;;  %1451 = vmatmul.msk.f32.vlgmr.msrb.gmra.mxu3 %vm324_vm1, %v453_v62 }
 0x280   :  { %628 = vperm.xlu0 %1531, %v2124_v0  }
 0x288   :  { %1535 = vset.pattern.permute.xlu0 %v2065_v1 }
 0x2f9   :  { %v491_v4 = vpop.f32.mrf.mxu1 }
 0x2fa   :  { %v492_v5 = vadd.f32 %v491_v4, %v461_v3 }
 0x2fc   :  { %v497_v9 = vadd.f32 %v492_v5, %v401_v47  ;;  %v600_v47 = vld [vmem:[#allocation5 + $0x20] sm:$0xff]  ;;  %v722_v5 = vld [vmem:[#allocation11 + $0x10] sm:$0xff] }
 0x2fe   :  { %v499_v12 = vmax.f32 %v497_v9, 0.0 }
 0x2ff   :  { %v494_v7 = vpop.f32.mrf.mxu3 }
 0x300   :  { %v495_v8 = vadd.f32 %v494_v7, %v467_v6  ;;  %v723_v6 = vld [vmem:[#allocation11 + $0x18] sm:$0xff] }
 0x302   :  { %v498_v10 = vadd.f32 %v495_v8, %v402_v48  ;;  %v601_v48 = vld [vmem:[#allocation5 + $0x28] sm:$0xff] }
 0x304   :  { %v500_v11 = vmax.f32 %v498_v10, 0.0  ;;  %v737_v10 = vpop.permute.xlu2 %736 }
 0x306   :  { %537 = vmatpush.msra.mxu2 %v500_v11  ;;  %582 = vmatpush.msra.mxu3 %v500_v11 }
 0x308   :  { %538 = vmatpush.msra.mxu2 %v499_v12  ;;  %583 = vmatpush.msra.mxu3 %v499_v12 }
 0x309   :  { %1452 = vmatmul.msk.f32.vlgmr.msra.gmra.mxu2 %vm324_vm1, %v501_v14  ;;  %1454 = vmatmul.msk.f32.vlgmr.msra.gmra.mxu3 %vm324_vm1, %v546_v15 }
 0x311   :  { %1453 = vmatmul.msk.f32.gmra.mxu2 %vm324_vm1, %v502_v16  ;;  %1455 = vmatmul.msk.f32.gmra.mxu3 %vm324_vm1, %v547_v17 }
 0x38c   :  { %v540_v19 = vpop.f32.mrf.mxu2  ;;  %v585_v25 = vpop.f32.mrf.mxu3 }
 0x38d   :  { %v541_v22 = vadd.f32 %v540_v19, %v510_v20  ;;  %v586_v42 = vadd.f32 %v585_v25, %v555_v37  ;;  %v773_v19 = vld [vmem:[#allocation13 + $0x18] sm:$0xff]  ;;  %v602_v37 = vld [vmem:[#allocation5 + $0x30] sm:$0xff] }
 0x38e   :  { %v1559_v20 = vld [vmem:[%s2256_s10 + $0x1] ss:$0 sm:$0xff] }
 0x38f   :  { %v591_v26 = vmul.f32 1.442695, %v541_v22  ;;  %834 = vperm.xlu1 %1529, %v1559_v20   ;;  %828 = vperm.xlu2 %1530, %v1559_v20   ;;  %v1560_v22 = vld [vmem:[#allocation19 + $0x1] ss:$0 sm:$0xff]  ;;  %v1563_v20 = vld [vmem:[#allocation10 + $0x2] ss:$0 sm:$0xff] }
 0x391   :  { %1570 = vpow2.f32 %v591_v26  ;;  %v781_v26 = vpop.permute.xlu0 %780 }
 0x394   :  { %v543_v27 = vpop.f32.mrf.mxu2  ;;  %v588_v34 = vpop.f32.mrf.mxu3 }
 0x395   :  { %v544_v31 = vadd.f32 %v543_v27, %v516_v18  ;;  %v589_v40 = vadd.f32 %v588_v34, %v561_v36  ;;  %v772_v18 = vld [vmem:[#allocation13 + $0x10] sm:$0xff]  ;;  %v787_v27 = vpop.permute.xlu2 %786 }
 0x396   :  { %v821_v36 = vld [vmem:[#allocation16 + $0x18] sm:$0xff] }
 0x397   :  { %v593_v32 = vmul.f32 1.442695, %v544_v31  ;;  %v1571_v35 = vpop.eup %1570  ;;  %884 = vperm.xlu1 %1529, %v1560_v22   ;;  %878 = vperm.xlu2 %1530, %v1560_v22   ;;  %v1564_v22 = vld [vmem:[%s2252_s6 + $0x2] ss:$0 sm:$0xff] }
 0x398   :  { %v595_v44 = vmul.f32 %v1571_v35, %v301_v38  ;;  %v820_v35 = vld [vmem:[#allocation16 + $0x10] sm:$0xff]  ;;  %v1561_v38 = vld [vmem:[%s2260_s14 + $0x1] ss:$0 sm:$0xff] }
 0x399   :  { %1572 = vpow2.f32 %v593_v32 }
 0x39a   :  { %v597_v46 = vadd.f32 %v595_v44, %v586_v42 }
 0x39f   :  { %v1573_v41 = vpop.eup %1572  ;;  %1532 = vset.pattern.permute.xlu1 %v2086_v13  ;;  %1533 = vset.pattern.permute.xlu2 %v2068_v2 }
 0x3a0   :  { %v596_v43 = vmul.f32 %v1573_v41, %v304_v39  ;;  %v2176_v39 = vld [vmem:[#allocation7 + $0x2] ss:$0 sm:$0xff] }
 0x3a1   :  { %980 = vperm.xlu0 %1535, %v2176_v39  }
 0x3a2   :  { %v598_v45 = vadd.f32 %v596_v43, %v589_v40 }
 0x3a4   :  { %654 = vmatpush.msrb.mxu1 %v598_v45 }
 0x3a6   :  { %655 = vmatpush.msrb.mxu1 %v597_v46 }
 0x3a7   :  { %622 = vperm.xlu1 %1532, %v2124_v0   ;;  %930 = vperm.xlu2 %1533, %v1561_v38   ;;  %v603_v0 = vld [vmem:[#allocation5 + $0x38] sm:$0xff] }
 0x3a8   :  { %656 = vmatpush.msrb.mxu1 %v2098_v24  ;;  %v617_v24 = vpop.permute.xlu1 %616 }
 0x3a9   :  { %1538 = vset.pattern.permute.xlu0 %v2068_v2 }
 0x3aa   :  { %657 = vmatpush.msrb.mxu1 %v2096_v23 }
 0x3ab   :  { %1456 = vmatmul.msk.f32.vlgmr.msrb.gmra.mxu1 %vm264_vm0, %v600_v47 }
 0x3af   :  { %1534 = vset.pattern.permute.xlu1 %v2065_v1  ;;  %986 = vperm.xlu2 %1533, %v2176_v39  }
 0x3b0   :  { %v683_v59 = vpop.permute.xlu1 %682 }
 0x3b3   :  { %1457 = vmatmul.msk.f32.gmra.mxu1 %vm264_vm0, %v601_v48 }
 0x3b7   :  { %924 = vperm.xlu1 %1534, %v1561_v38   ;;  %1537 = vset.pattern.permute.xlu2 %v2065_v1 }
 0x3b8   :  { %v731_v8 = vpop.permute.xlu1 %730 }
 0x3bb   :  { %1458 = vmatmul.msk.f32.gmra.mxu1 %vm264_vm0, %v602_v37 }
 0x3bf   :  { %1536 = vset.pattern.permute.xlu1 %v2068_v2  ;;  %1052 = vperm.xlu2 %1537, %v1563_v20  }
 0x3c3   :  { %1459 = vmatmul.msk.f32.gmra.mxu1 %vm264_vm0, %v603_v0 }
 0x3c7   :  { %1058 = vperm.xlu1 %1536, %v1563_v20   ;;  %1100 = vperm.xlu2 %1537, %v1564_v22   ;;  %v1286_v20 = vld [vmem:[#allocation20 + $0x20] sm:$0xff] }
 0x3cf   :  { %1106 = vperm.xlu1 %1536, %v1564_v22   ;;  %1540 = vset.pattern.permute.xlu2 %v2068_v2 }
 0x3d7   :  { %1539 = vset.pattern.permute.xlu1 %v2065_v1 }
 0x3e9   :  { %v829_v41 = vpop.permute.xlu2 %828 }
 0x401   :  { %v835_v43 = vpop.permute.xlu1 %834 }
 0x428   :  { %v659_v49 = vpop.f32.mrf.mxu1 }
 0x429   :  { %v2144_v51 = vadd.f32 %v659_v49, %v611_v50  ;;  %v916_v49 = vld [vmem:[#allocation20 + $0x10] sm:$0xff]  ;;  %v917_v50 = vld [vmem:[#allocation20 + $0x18] sm:$0xff] }
 0x42b   :  { %v671_v54 = vmax.f32 %v2144_v51, 0.0 }
 0x430   :  { %v662_v23 = vpop.f32.mrf.mxu1 }
 0x431   :  { %v2146_v52 = vadd.f32 %v662_v23, %v617_v24  ;;  %v871_v24 = vld [vmem:[#allocation17 + $0x18] sm:$0xff]  ;;  %v885_v23 = vpop.permute.xlu1 %884 }
 0x433   :  { %v672_v53 = vmax.f32 %v2146_v52, 0.0 }
 0x435   :  { %710 = vmatpush.msrb.mxu2 %v672_v53 }
 0x437   :  { %711 = vmatpush.msrb.mxu2 %v671_v54  ;;  %v879_v54 = vpop.permute.xlu2 %878 }
 0x438   :  { %1460 = vmatmul.msk.f32.vlgmr.msrb.gmra.mxu2 %vm324_vm1, %v674_v55 }
 0x440   :  { %1461 = vmatmul.msk.f32.gmra.mxu2 %vm324_vm1, %v675_v56  ;;  %v665_v56 = vpop.f32.mrf.mxu1 }
 0x4bb   :  { %v713_v58 = vpop.f32.mrf.mxu2 }
 0x4bc   :  { %v714_v62 = vadd.f32 %v713_v58, %v683_v59  ;;  %v623_v59 = vpop.permute.xlu1 %622 }
 0x4be   :  { %v719_v4 = vmax.f32 %v714_v62, 0.0 }
 0x4c3   :  { %v716_v61 = vpop.f32.mrf.mxu2 }
 0x4c4   :  { %v717_v63 = vadd.f32 %v716_v61, %v689_v60 }
 0x4c6   :  { %v720_v3 = vmax.f32 %v717_v63, 0.0  ;;  %v629_v63 = vpop.permute.xlu0 %628 }
 0x4c8   :  { %758 = vmatpush.msrb.mxu3 %v720_v3  ;;  %v668_v3 = vpop.f32.mrf.mxu1 }
 0x4ca   :  { %759 = vmatpush.msrb.mxu3 %v719_v4 }
 0x4cb   :  { %1462 = vmatmul.msk.f32.vlgmr.msrb.gmra.mxu3 %vm324_vm1, %v722_v5  ;;  %v669_v5 = vadd.f32 %v668_v3, %v629_v63 }
 0x4d3   :  { %1463 = vmatmul.msk.f32.gmra.mxu3 %vm324_vm1, %v723_v6 }
 0x54e   :  { %v761_v7 = vpop.f32.mrf.mxu3 }
 0x54f   :  { %v762_v9 = vadd.f32 %v761_v7, %v731_v8  ;;  %v925_v7 = vpop.permute.xlu1 %924  ;;  %v931_v8 = vpop.permute.xlu2 %930 }
 0x551   :  { %v767_v14 = vadd.f32 %v762_v9, %v2144_v51  ;;  %v666_v9 = vadd.f32 %v665_v56, %v623_v59  ;;  %v1143_v56 = vld [vmem:[#allocation13 + $0x28] sm:$0xff] }
 0x553   :  { %v769_v17 = vmax.f32 %v767_v14, 0.0 }
 0x556   :  { %v764_v11 = vpop.f32.mrf.mxu3 }
 0x557   :  { %v765_v12 = vadd.f32 %v764_v11, %v737_v10  ;;  %v1059_v37 = vpop.permute.xlu1 %1058 }
 0x559   :  { %v768_v15 = vadd.f32 %v765_v12, %v2146_v52 }
 0x55b   :  { %v770_v16 = vmax.f32 %v768_v15, 0.0 }
 0x55d   :  { %808 = vmatpush.msra.mxu0 %v770_v16 }
 0x55f   :  { %809 = vmatpush.msra.mxu0 %v769_v17 }
 0x560   :  { %1464 = vmatmul.msk.f32.vlgmr.msra.gmra.mxu0 %vm324_vm1, %v772_v18  ;;  %v970_v18 = vld [vmem:[#allocation5 + $0x40] sm:$0xff] }
 0x568   :  { %1465 = vmatmul.msk.f32.gmra.mxu0 %vm324_vm1, %v773_v19  ;;  %v971_v19 = vld [vmem:[#allocation5 + $0x48] sm:$0xff] }
 0x5dd   :  { %v811_v25 = vpop.f32.mrf.mxu0 }
 0x5de   :  { %v812_v31 = vadd.f32 %v811_v25, %v781_v26  ;;  %v981_v26 = vpop.permute.xlu0 %980 }
 0x5e0   :  { %v817_v34 = vmax.f32 %v812_v31, 0.0 }
 0x5e5   :  { %v814_v28 = vpop.f32.mrf.mxu0 }
 0x5e6   :  { %v815_v32 = vadd.f32 %v814_v28, %v787_v27 }
 0x5e8   :  { %v818_v33 = vmax.f32 %v815_v32, 0.0 }
 0x5ea   :  { %856 = vmatpush.msra.mxu2 %v818_v33  ;;  %v1044_v33 = vld [vmem:[#allocation8 + $0x20] sm:$0xff] }
 0x5ec   :  { %857 = vmatpush.msra.mxu2 %v817_v34  ;;  %v1045_v34 = vld [vmem:[#allocation8 + $0x28] sm:$0xff] }
 0x5ed   :  { %1466 = vmatmul.msk.f32.vlgmr.msra.gmra.mxu2 %vm324_vm1, %v820_v35 }
 0x5f5   :  { %1467 = vmatmul.msk.f32.gmra.mxu2 %vm324_vm1, %v821_v36 }
 0x670   :  { %v859_v40 = vpop.f32.mrf.mxu2 }
 0x671   :  { %v860_v42 = vadd.f32 %v859_v40, %v829_v41 }
 0x673   :  { %v865_v46 = vadd.f32 %v860_v42, %v767_v14 }
 0x675   :  { %v867_v29 = vmax.f32 %v865_v46, 0.0  ;;  %v1566_v46 = vld [vmem:[%s2256_s10 + $0x2] ss:$0 sm:$0xff] }
 0x676   :  { %1204 = vperm.xlu2 %1540, %v1566_v46  }
 0x678   :  { %v862_v44 = vpop.f32.mrf.mxu2 }
 0x679   :  { %v863_v45 = vadd.f32 %v862_v44, %v835_v43  ;;  %v1092_v43 = vld [vmem:[#allocation11 + $0x20] sm:$0xff]  ;;  %v1093_v44 = vld [vmem:[#allocation11 + $0x28] sm:$0xff] }
 0x67b   :  { %v866_v47 = vadd.f32 %v863_v45, %v768_v15  ;;  %v1565_v45 = vld [vmem:[#allocation14 + $0x2] ss:$0 sm:$0xff] }
 0x67c   :  { %1150 = vperm.xlu1 %1539, %v1565_v45   ;;  %1156 = vperm.xlu0 %1538, %v1565_v45  }
 0x67d   :  { %v868_v48 = vmax.f32 %v866_v47, 0.0 }
 0x67f   :  { %906 = vmatpush.msra.mxu3 %v868_v48  ;;  %952 = vmatpush.msrb.mxu0 %v868_v48 }
 0x681   :  { %907 = vmatpush.msra.mxu3 %v867_v29  ;;  %953 = vmatpush.msrb.mxu0 %v867_v29 }
 0x682   :  { %1468 = vmatmul.msk.f32.vlgmr.msra.gmra.mxu3 %vm324_vm1, %v870_v30  ;;  %1470 = vmatmul.msk.f32.vlgmr.msrb.gmra.mxu0 %vm324_vm1, %v916_v49  ;;  %v1107_v30 = vpop.permute.xlu1 %1106 }
 0x684   :  { %1198 = vperm.xlu1 %1539, %v1566_v46   ;;  %1541 = vset.pattern.permute.xlu0 %v2065_v1 }
 0x68a   :  { %1469 = vmatmul.msk.f32.gmra.mxu3 %vm324_vm1, %v871_v24  ;;  %1471 = vmatmul.msk.f32.gmra.mxu0 %vm324_vm1, %v917_v50 }
 0x68c   :  { %1542 = vset.pattern.permute.xlu1 %v2094_v21 }
 0x694   :  { %998 = vperm.xlu1 %1542, %v2176_v39  }
 0x69c   :  { %1544 = vset.pattern.permute.xlu1 %v2068_v2  ;;  %v1191_v2 = vld [vmem:[#allocation16 + $0x28] sm:$0xff] }
 0x6ee   :  { %v1151_v59 = vpop.permute.xlu1 %1150 }
 0x6ff   :  { %v955_v57 = vpop.f32.mrf.mxu0 }
 0x700   :  { %v956_v14 = vadd.f32 %v955_v57, %v925_v7  ;;  %v1567_v57 = vld [vmem:[#allocation19 + $0x2] ss:$0 sm:$0xff] }
 0x701   :  { %1254 = vperm.xlu2 %1540, %v1567_v57   ;;  %1248 = vperm.xlu0 %1541, %v1567_v57   ;;  %v973_v7 = vld [vmem:[#allocation5 + $0x58] sm:$0xff] }
 0x705   :  { %v909_v53 = vpop.f32.mrf.mxu3 }
 0x706   :  { %v910_v55 = vadd.f32 %v909_v53, %v879_v54 }
 0x707   :  { %v958_v4 = vpop.f32.mrf.mxu0 }
 0x708   :  { %v961_v58 = vmul.f32 1.442695, %v910_v55  ;;  %v959_v10 = vadd.f32 %v958_v4, %v931_v8  ;;  %v1142_v55 = vld [vmem:[#allocation13 + $0x20] sm:$0xff]  ;;  %v1569_v8 = vld [vmem:[#allocation7 + $0x3] ss:$0 sm:$0xff] }
 0x709   :  { %1543 = vset.pattern.permute.xlu2 %v2086_v13  ;;  %1350 = vperm.xlu0 %1541, %v1569_v8  }
 0x70a   :  { %1574 = vpow2.f32 %v961_v58 }
 0x70d   :  { %v912_v60 = vpop.f32.mrf.mxu3 }
 0x70e   :  { %v913_v61 = vadd.f32 %v912_v60, %v885_v23  ;;  %v1157_v60 = vpop.permute.xlu0 %1156 }
 0x710   :  { %v963_v62 = vmul.f32 1.442695, %v913_v61  ;;  %v1575_v6 = vpop.eup %1574 }
 0x711   :  { %v965_v12 = vmul.f32 %v1575_v6, %v666_v9  ;;  %992 = vperm.xlu2 %1543, %v2176_v39   ;;  %v972_v6 = vld [vmem:[#allocation5 + $0x50] sm:$0xff]  ;;  %v1568_v39 = vld [vmem:[%s2260_s14 + $0x2] ss:$0 sm:$0xff]  ;;  %1547 = vset.pattern.permute.xlu0 %v2094_v21  ;;  %v1287_v21 = vld [vmem:[#allocation20 + $0x28] sm:$0xff]  ;;  %s1924_s14 = smov [#allocation22]  }
 0x712   :  { %1576 = vpow2.f32 %v963_v62  ;;  %1300 = vperm.xlu1 %1544, %v1568_v39   ;;  %s1419_s3 = sshll.u32 %s1924_s14, 4  ;;  %s1420_s3 = int_to_ptr.vmem [resolvable:$true] %s1419_s3 }
 0x713   :  { %v967_v17 = vadd.f32 %v965_v12, %v956_v14 }
 0x718   :  { %v1577_v11 = vpop.eup %1576 }
 0x719   :  { %v966_v15 = vmul.f32 %v1577_v11, %v669_v5  ;;  %v1190_v5 = vld [vmem:[#allocation16 + $0x20] sm:$0xff]  ;;  %1545 = vset.pattern.permute.xlu2 %v2065_v1  ;;  %v1199_v1 = vpop.permute.xlu1 %1198  ;;  %1368 = vperm.xlu0 %1547, %v1569_v8  }
 0x71a   :  { %1356 = vperm.xlu1 %1544, %v1569_v8  }
 0x71b   :  { %v968_v16 = vadd.f32 %v966_v15, %v959_v10 }
 0x71d   :  { %1024 = vmatpush.msra.mxu1 %v968_v16 }
 0x71f   :  { %1025 = vmatpush.msra.mxu1 %v967_v17 }
 0x721   :  { %1026 = vmatpush.msra.mxu1 %v2146_v52  ;;  %v987_v52 = vpop.permute.xlu2 %986  ;;  %1294 = vperm.xlu2 %1545, %v1568_v39  }
 0x723   :  { %1027 = vmatpush.msra.mxu1 %v2144_v51 }
 0x724   :  { %1472 = vmatmul.msk.f32.vlgmr.msra.gmra.mxu1 %vm264_vm0, %v970_v18 }
 0x729   :  { %v1053_v36 = vpop.permute.xlu2 %1052  ;;  %1546 = vset.pattern.permute.xlu2 %v2086_v13  ;;  %v1241_v13 = vld [vmem:[#allocation17 + $0x28] sm:$0xff] }
 0x72c   :  { %1473 = vmatmul.msk.f32.gmra.mxu1 %vm264_vm0, %v971_v19  ;;  %v1240_v19 = vld [vmem:[#allocation17 + $0x20] sm:$0xff] }
 0x731   :  { %v1101_v48 = vpop.permute.xlu2 %1100  ;;  %1362 = vperm.xlu2 %1546, %v1569_v8  }
 0x734   :  { %1474 = vmatmul.msk.f32.gmra.mxu1 %vm264_vm0, %v972_v6 }
 0x739   :  { %v1205_v11 = vpop.permute.xlu2 %1204 }
 0x73c   :  { %1475 = vmatmul.msk.f32.gmra.mxu1 %vm264_vm0, %v973_v7 }
 0x75b   :  { %v1255_v22 = vpop.permute.xlu2 %1254 }
 0x7a1   :  { %v1029_v25 = vpop.f32.mrf.mxu1 }
 0x7a2   :  { %v2195_v28 = vadd.f32 %v1029_v25, %v981_v26  ;;  %v1249_v25 = vpop.permute.xlu0 %1248 }
 0x7a4   :  { %v1041_v32 = vmax.f32 %v2195_v28, 0.0 }
 0x7a9   :  { %v1032_v27 = vpop.f32.mrf.mxu1 }
 0x7aa   :  { %v2197_v51 = vadd.f32 %v1032_v27, %v987_v52 }
 0x7ac   :  { %v1042_v31 = vmax.f32 %v2197_v51, 0.0 }
 0x7ae   :  { %1080 = vmatpush.msrb.mxu2 %v1042_v31 }
 0x7b0   :  { %1081 = vmatpush.msrb.mxu2 %v1041_v32 }
 0x7b1   :  { %1476 = vmatmul.msk.f32.vlgmr.msrb.gmra.mxu2 %vm324_vm1, %v1044_v33  ;;  %v1035_v27 = vpop.f32.mrf.mxu1  ;;  %v999_v33 = vpop.permute.xlu1 %998 }
 0x7b9   :  { %1477 = vmatmul.msk.f32.gmra.mxu2 %vm324_vm1, %v1045_v34  ;;  %v993_v34 = vpop.permute.xlu2 %992 }
 0x834   :  { %v1083_v35 = vpop.f32.mrf.mxu2 }
 0x835   :  { %v1084_v40 = vadd.f32 %v1083_v35, %v1053_v36 }
 0x837   :  { %v1089_v42 = vmax.f32 %v1084_v40, 0.0 }
 0x83c   :  { %v1086_v38 = vpop.f32.mrf.mxu2 }
 0x83d   :  { %v1087_v0 = vadd.f32 %v1086_v38, %v1059_v37  ;;  %v1038_v38 = vpop.f32.mrf.mxu1 }
 0x83f   :  { %v1090_v41 = vmax.f32 %v1087_v0, 0.0 }
 0x841   :  { %1128 = vmatpush.msrb.mxu3 %v1090_v41  ;;  %v1301_v41 = vpop.permute.xlu1 %1300 }
 0x843   :  { %1129 = vmatpush.msrb.mxu3 %v1089_v42  ;;  %v1295_v42 = vpop.permute.xlu2 %1294 }
 0x844   :  { %1478 = vmatmul.msk.f32.vlgmr.msrb.gmra.mxu3 %vm324_vm1, %v1092_v43  ;;  %v1036_v43 = vadd.f32 %v1035_v27, %v993_v34 }
 0x849   :  { %v1357_v57 = vpop.permute.xlu1 %1356 }
 0x84c   :  { %1479 = vmatmul.msk.f32.gmra.mxu3 %vm324_vm1, %v1093_v44  ;;  %v1039_v44 = vadd.f32 %v1038_v38, %v999_v33 }
 0x8c7   :  { %v1131_v47 = vpop.f32.mrf.mxu3 }
 0x8c8   :  { %v1132_v29 = vadd.f32 %v1131_v47, %v1101_v48 }
 0x8ca   :  { %v1137_v50 = vadd.f32 %v1132_v29, %v2195_v28 }
 0x8cc   :  { %v1139_v54 = vmax.f32 %v1137_v50, 0.0 }
 0x8cf   :  { %v1134_v49 = vpop.f32.mrf.mxu3 }
 0x8d0   :  { %v1135_v24 = vadd.f32 %v1134_v49, %v1107_v30 }
 0x8d2   :  { %v1138_v23 = vadd.f32 %v1135_v24, %v2197_v51  ;;  %v1340_v24 = vld [vmem:[#allocation5 + $0x60] sm:$0xff] }
 0x8d4   :  { %v1140_v53 = vmax.f32 %v1138_v23, 0.0 }
 0x8d6   :  { %1178 = vmatpush.msra.mxu0 %v1140_v53  ;;  %v1343_v53 = vld [vmem:[#allocation5 + $0x78] sm:$0xff] }
 0x8d8   :  { %1179 = vmatpush.msra.mxu0 %v1139_v54  ;;  %v1351_v54 = vpop.permute.xlu0 %1350 }
 0x8d9   :  { %1480 = vmatmul.msk.f32.vlgmr.msra.gmra.mxu0 %vm324_vm1, %v1142_v55 }
 0x8e1   :  { %1481 = vmatmul.msk.f32.gmra.mxu0 %vm324_vm1, %v1143_v56 }
 0x956   :  { %v1181_v58 = vpop.f32.mrf.mxu0 }
 0x957   :  { %v1182_v62 = vadd.f32 %v1181_v58, %v1151_v59 }
 0x959   :  { %v1187_v4 = vmax.f32 %v1182_v62, 0.0 }
 0x95e   :  { %v1184_v61 = vpop.f32.mrf.mxu0 }
 0x95f   :  { %v1185_v63 = vadd.f32 %v1184_v61, %v1157_v60  ;;  %v1369_v61 = vpop.permute.xlu0 %1368 }
 0x961   :  { %v1188_v3 = vmax.f32 %v1185_v63, 0.0 }
 0x963   :  { %1226 = vmatpush.msra.mxu2 %v1188_v3 }
 0x965   :  { %1227 = vmatpush.msra.mxu2 %v1187_v4 }
 0x966   :  { %1482 = vmatmul.msk.f32.vlgmr.msra.gmra.mxu2 %vm324_vm1, %v1190_v5 }
 0x96e   :  { %1483 = vmatmul.msk.f32.gmra.mxu2 %vm324_vm1, %v1191_v2 }
 0x9e9   :  { %v1229_v9 = vpop.f32.mrf.mxu2 }
 0x9ea   :  { %v1230_v10 = vadd.f32 %v1229_v9, %v1199_v1 }
 0x9ec   :  { %v1235_v15 = vadd.f32 %v1230_v10, %v1137_v50  ;;  %v1341_v50 = vld [vmem:[#allocation5 + $0x68] sm:$0xff] }
 0x9ee   :  { %v1237_v18 = vmax.f32 %v1235_v15, 0.0 }
 0x9f1   :  { %v1232_v12 = vpop.f32.mrf.mxu2 }
 0x9f2   :  { %v1233_v14 = vadd.f32 %v1232_v12, %v1205_v11 }
 0x9f4   :  { %v1236_v16 = vadd.f32 %v1233_v14, %v1138_v23  ;;  %v1342_v23 = vld [vmem:[#allocation5 + $0x70] sm:$0xff] }
 0x9f6   :  { %v1238_v17 = vmax.f32 %v1236_v16, 0.0 }
 0x9f8   :  { %1276 = vmatpush.msra.mxu3 %v1238_v17  ;;  %1322 = vmatpush.msrb.mxu0 %v1238_v17 }
 0x9fa   :  { %1277 = vmatpush.msra.mxu3 %v1237_v18  ;;  %1323 = vmatpush.msrb.mxu0 %v1237_v18 }
 0x9fb   :  { %1484 = vmatmul.msk.f32.vlgmr.msra.gmra.mxu3 %vm324_vm1, %v1240_v19  ;;  %1486 = vmatmul.msk.f32.vlgmr.msrb.gmra.mxu0 %vm324_vm1, %v1286_v20 }
 0xa03   :  { %1485 = vmatmul.msk.f32.gmra.mxu3 %vm324_vm1, %v1241_v13  ;;  %1487 = vmatmul.msk.f32.gmra.mxu0 %vm324_vm1, %v1287_v21 }
 0xa78   :  { %v1325_v31 = vpop.f32.mrf.mxu0 }
 0xa79   :  { %v1326_v48 = vadd.f32 %v1325_v31, %v1295_v42 }
 0xa7e   :  { %v1279_v26 = vpop.f32.mrf.mxu3 }
 0xa7f   :  { %v1280_v52 = vadd.f32 %v1279_v26, %v1249_v25 }
 0xa80   :  { %v1328_v40 = vpop.f32.mrf.mxu0 }
 0xa81   :  { %v1331_v32 = vmul.f32 1.442695, %v1280_v52  ;;  %v1329_v45 = vadd.f32 %v1328_v40, %v1301_v41 }
 0xa83   :  { %1578 = vpow2.f32 %v1331_v32 }
 0xa86   :  { %v1282_v35 = vpop.f32.mrf.mxu3 }
 0xa87   :  { %v1283_v36 = vadd.f32 %v1282_v35, %v1255_v22 }
 0xa89   :  { %v1333_v37 = vmul.f32 1.442695, %v1283_v36  ;;  %v1579_v0 = vpop.eup %1578 }
 0xa8a   :  { %v1335_v47 = vmul.f32 %v1579_v0, %v1036_v43 }
 0xa8b   :  { %1580 = vpow2.f32 %v1333_v37 }
 0xa8c   :  { %v1337_v49 = vadd.f32 %v1335_v47, %v1326_v48 }
 0xa91   :  { %v1581_v46 = vpop.eup %1580 }
 0xa92   :  { %v1336_v29 = vmul.f32 %v1581_v46, %v1039_v44 }
 0xa94   :  { %v1338_v30 = vadd.f32 %v1336_v29, %v1329_v45 }
 0xa96   :  { %1394 = vmatpush.msrb.mxu1 %v1338_v30 }
 0xa98   :  { %1395 = vmatpush.msrb.mxu1 %v1337_v49 }
 0xa9a   :  { %1396 = vmatpush.msrb.mxu1 %v2197_v51 }
 0xa9c   :  { %1397 = vmatpush.msrb.mxu1 %v2195_v28  ;;  %v1363_v28 = vpop.permute.xlu2 %1362 }
 0xa9d   :  { %1488 = vmatmul.msk.f32.vlgmr.msrb.gmra.mxu1 %vm264_vm0, %v1340_v24 }
 0xaa5   :  { %1489 = vmatmul.msk.f32.gmra.mxu1 %vm264_vm0, %v1341_v50 }
 0xaad   :  { %1490 = vmatmul.msk.f32.gmra.mxu1 %vm264_vm0, %v1342_v23 }
 0xab5   :  { %1491 = vmatmul.msk.f32.gmra.mxu1 %vm264_vm0, %v1343_v53 }
 0xb1a   :  { %v1399_v55 = vpop.f32.mrf.mxu1 }
 0xb1b   :  { %v1400_v56 = vadd.f32 %v1399_v55, %v1351_v54 }
 0xb1d   :  { %1411 = vst [vmem:[#allocation22] sm:$0xff] %v1400_v56 }
 0xb22   :  { %v1402_v51 = vpop.f32.mrf.mxu1 }
 0xb23   :  { %v1403_v58 = vadd.f32 %v1402_v51, %v1357_v57 }
 0xb25   :  { %1412 = vst [vmem:[#allocation22 + $0x8] sm:$0xff] %v1403_v58 }
 0xb2a   :  { %v1405_v59 = vpop.f32.mrf.mxu1 }
 0xb2b   :  { %v1406_v60 = vadd.f32 %v1405_v59, %v1363_v28 }
 0xb2d   :  { %1413 = vst [vmem:[#allocation22 + $0x10] sm:$0xff] %v1406_v60 }
 0xb32   :  { %v1408_v62 = vpop.f32.mrf.mxu1 }
 0xb33   :  { %v1409_v63 = vadd.f32 %v1408_v62, %v1369_v61 }
 0xb35   :  { %1414 = vst [vmem:[#allocation22 + $0x18] sm:$0xff] %v1409_v63 }
 0xb36   :  { %1427 = dma.vmem_to_hbm [thread:$0]  %s1420_s3, 512, %s1422_s17, [#allocation4], %s1911_s26, %s1911_s26, %s1912_s27  }
 0xb37   :  { %1908 = dma.done.wait [#allocation4], 512  }
 0xb38   :  { %1909 = vsyncadd [#allocation4], 4294966784 }
 0xb39   :  { %1432 = vsyncpa [#allocation3], 1 }
 0xb3a   :  { %1433 = vsyncpa [#allocation6], 1 }
 0xb3b   :  { %1434 = vsyncpa [#allocation9], 1 }
 0xb3c   :  { %1435 = vsyncpa [#allocation12], 1 }
 0xb3d   :  { %1436 = vsyncpa [#allocation15], 1 }
 0xb3e   :  { %1437 = vsyncpa [#allocation18], 1 }
 0xb3f   :  { %1438 = vsyncpa [#allocation21], 1 }
 0xb40   :  { %1439 = vsyncpa [#allocation4], 1 }

</bundles_post_ra>
